<compile_context>
chip_gen: v6e
topology: v6e:2x2x1
jax: 0.10.0
libtpu: 0.0.40
codegen_flags: <defaults>
</compile_context>

<pallas_src>
import functools
import math

import jax
import jax.numpy as jnp
from jax import lax
from jax.experimental import pallas as pl
from jax.experimental.pallas import tpu as pltpu


def _round_up(x, m):
    return ((x + m - 1) // m) * m


def _pick_tile(dim, max_tile, align):
    """Largest multiple of `align` <= max_tile dividing round_up(dim, align).

    Guarantees the (minimally) padded dim is an exact multiple of the tile, so
    wrapper-side padding is at most `align - 1` elements instead of a whole
    tile's worth of HBM copy.
    """
    d = _round_up(dim, align)
    if d <= max_tile:
        return d
    t = (max_tile // align) * align
    while t > align:
        if d % t == 0:
            return t
        t -= align
    return align


# ---------------------------------------------------------------------------
# Tiled matmul (+ optional bias) kernel:  y = x @ w (+ b)
# ---------------------------------------------------------------------------
def _linear_kernel(*refs, has_bias):
    if has_bias:
        x_ref, w_ref, b_ref, o_ref, acc_ref = refs
    else:
        x_ref, w_ref, o_ref, acc_ref = refs
        b_ref = None

    k = pl.program_id(2)

    @pl.when(k == 0)
    def _():
        acc_ref[...] = jnp.zeros_like(acc_ref)

    acc_ref[...] += jnp.dot(
        x_ref[...], w_ref[...], preferred_element_type=jnp.float32
    )

    @pl.when(k == pl.num_programs(2) - 1)
    def _():
        y = acc_ref[...]
        if b_ref is not None:
            y = y + b_ref[...].astype(jnp.float32)
        o_ref[...] = y.astype(o_ref.dtype)


def _linear_tile_defaults():
    """Per-generation tile plan: big tiles on 128-MiB-VMEM chips (v5e/v6e),
    capped tiles on v7x (64 MiB)."""
    try:
        vmem = pltpu.get_tpu_info().vmem_capacity_bytes
    except Exception:
        vmem = 64 << 20
    if vmem >= (100 << 20):          # v5e / v6e
        return 512, 1024, 1024, 96 << 20
    return 256, 512, 512, None       # v7x-safe


def linear(x, w, b=None, *, block_m=None, block_n=None, block_k=None):
    """y = x @ w + b.   x: (M, K), w: (K, N), b: (N,) or None."""
    M, K = x.shape
    K2, N = w.shape
    assert K == K2
    out_dtype = x.dtype

    dm, dn, dk, vmem_limit = _linear_tile_defaults()
    block_m = dm if block_m is None else block_m
    block_n = dn if block_n is None else block_n
    block_k = dk if block_k is None else block_k

    tm = _pick_tile(M, block_m, 8)
    tn = _pick_tile(N, block_n, 128)
    tk = _pick_tile(K, block_k, 128)

    Mp, Np, Kp = _round_up(M, 8), _round_up(N, 128), _round_up(K, 128)

    xp = x if (Mp, Kp) == (M, K) else jnp.pad(x, ((0, Mp - M), (0, Kp - K)))
    wp = w if (Kp, Np) == (K, N) else jnp.pad(w, ((0, Kp - K), (0, Np - N)))

    has_bias = b is not None
    args = [xp, wp]
    in_specs = [
        pl.BlockSpec((tm, tk), lambda i, j, kk: (i, kk)),
        pl.BlockSpec((tk, tn), lambda i, j, kk: (kk, j)),
    ]
    if has_bias:
        bp = b if Np == N else jnp.pad(b, (0, Np - N))
        args.append(bp.reshape(1, Np))
        in_specs.append(pl.BlockSpec((1, tn), lambda i, j, kk: (0, j)))

    itemsize = jnp.dtype(x.dtype).itemsize
    cost = pl.CostEstimate(
        flops=2 * M * N * K,
        transcendentals=0,
        bytes_accessed=itemsize
        * (M * K + K * N + M * N + (N if has_bias else 0)),
    )

    cp_kwargs = dict(dimension_semantics=("parallel", "parallel", "arbitrary"))
    if vmem_limit is not None:
        cp_kwargs["vmem_limit_bytes"] = int(vmem_limit)

    out = pl.pallas_call(
        functools.partial(_linear_kernel, has_bias=has_bias),
        out_shape=jax.ShapeDtypeStruct((Mp, Np), out_dtype),
        grid_spec=pltpu.PrefetchScalarGridSpec(
            num_scalar_prefetch=0,
            grid=(Mp // tm, Np // tn, Kp // tk),
            in_specs=in_specs,
            out_specs=pl.BlockSpec((tm, tn), lambda i, j, kk: (i, j)),
            scratch_shapes=[pltpu.VMEM((tm, tn), jnp.float32)],
        ),
        compiler_params=pltpu.CompilerParams(**cp_kwargs),
        cost_estimate=cost,
    )(*args)

    if (Mp, Np) != (M, N):
        out = out[:M, :N]
    return out


# ---------------------------------------------------------------------------
# Fused-layout flash attention:
#   reads q/k/v column blocks straight from the (B, N, 3*inner) qkv buffer,
#   writes (B, N, inner) head-interleaved output (no wrapper transposes).
# ---------------------------------------------------------------------------
def _flash_kernel(q_ref, k_ref, v_ref, o_ref, m_sc, l_sc, acc_sc, *,
                  scale, seq_len, block_k, group, dim_head):
    kv = pl.program_id(3)

    @pl.when(kv == 0)
    def _():
        m_sc[...] = jnp.full_like(m_sc, -jnp.inf)
        l_sc[...] = jnp.zeros_like(l_sc)
        acc_sc[...] = jnp.zeros_like(acc_sc)

    q_all = q_ref[0]                     # (tq, group*dh)
    k_all = k_ref[0]                     # (tk, group*dh)
    v_all = v_ref[0]                     # (tk, group*dh)

    needs_mask = (seq_len % block_k) != 0   # static condition

    for h in range(group):               # unrolled at trace time
        lo = h * dim_head
        hi = lo + dim_head
        # Fold the softmax scale into q ((tq,dh) multiply instead of (tq,tk))
        # and feed bf16 operands to the MXU; accumulate in f32.
        qh = (q_all[:, lo:hi] * scale).astype(jnp.bfloat16)
        kh = k_all[:, lo:hi].astype(jnp.bfloat16)
        vh = v_all[:, lo:hi].astype(jnp.bfloat16)

        s = lax.dot_general(
            qh, kh, (((1,), (1,)), ((), ())),
            preferred_element_type=jnp.float32,
        )                                # (tq, tk)

        if needs_mask:
            kv_ids = kv * block_k + lax.broadcasted_iota(jnp.int32, s.shape, 1)
            s = jnp.where(kv_ids < seq_len, s, -jnp.inf)

        m_prev = m_sc[h]
        m_new = jnp.maximum(m_prev, s.max(axis=-1, keepdims=True))
        alpha = jnp.exp(m_prev - m_new)
        p = jnp.exp(s - m_new)

        l_sc[h] = alpha * l_sc[h] + p.sum(axis=-1, keepdims=True)
        acc_sc[h] = alpha * acc_sc[h] + jnp.dot(
            p.astype(jnp.bfloat16), vh, preferred_element_type=jnp.float32
        )
        m_sc[h] = m_new

    @pl.when(kv == pl.num_programs(3) - 1)
    def _():
        outs = []
        for h in range(group):
            inv_l = pl.reciprocal(l_sc[h], approx=True)
            outs.append(acc_sc[h] * inv_l)
        # Lane-dense (tq, group*dh >= 128) store.
        o_ref[0] = jnp.concatenate(outs, axis=-1).astype(o_ref.dtype)


def attention_core(qkv, *, heads, dim_head, scale, block_q=512, block_k=256):
    """softmax(q k^T * scale) @ v for qkv: (B, N, 3*heads*dim_head)
    -> (B, N, heads*dim_head)."""
    B, N, w3 = qkv.shape
    inner = heads * dim_head
    assert w3 == 3 * inner
    dtype = qkv.dtype

    # Pack heads into groups whose lane width is a multiple of 128 so every
    # block load/store is lane-dense and satisfies the (8,128) constraint.
    group = None
    for g in range(1, heads + 1):
        if heads % g == 0 and (g * dim_head) % 128 == 0:
            group = g
            break
    if group is None:
        # TODO(synk): head configs that never pack to a 128-lane multiple would
        # need a head-transposed fallback layout; not needed for this module.
        raise NotImplementedError(
            f"Unsupported (heads={heads}, dim_head={dim_head}) for the fused "
            "qkv-layout attention kernel.")

    gw = group * dim_head            # lane width of one head group (mult of 128)
    hg = heads // group              # number of head groups

    tq = _pick_tile(N, block_q, 8)
    tk = _pick_tile(N, block_k, 8)
    Np = _round_up(N, 8)
    if Np != N:
        qkv = jnp.pad(qkv, ((0, 0), (0, Np - N), (0, 0)))

    q_tiles = Np // tq
    itemsize = jnp.dtype(dtype).itemsize
    cost = pl.CostEstimate(
        flops=4 * B * heads * N * N * dim_head,
        transcendentals=B * heads * N * N,
        bytes_accessed=itemsize * B * Np * inner * (2 + 2 * q_tiles),
    )

    kernel = functools.partial(
        _flash_kernel, scale=scale, seq_len=N, block_k=tk,
        group=group, dim_head=dim_head,
    )

    out = pl.pallas_call(
        kernel,
        out_shape=jax.ShapeDtypeStruct((B, Np, inner), dtype),
        grid_spec=pltpu.PrefetchScalarGridSpec(
            num_scalar_prefetch=0,
            grid=(B, hg, q_tiles, Np // tk),
            in_specs=[
                # q columns start at block 0, k at block hg, v at block 2*hg
                # (in units of gw columns) of the fused qkv buffer.
                pl.BlockSpec((1, tq, gw), lambda b, hp, i, j: (b, i, hp)),
                pl.BlockSpec((1, tk, gw), lambda b, hp, i, j: (b, j, hg + hp)),
                pl.BlockSpec((1, tk, gw), lambda b, hp, i, j: (b, j, 2 * hg + hp)),
            ],
            out_specs=pl.BlockSpec((1, tq, gw), lambda b, hp, i, j: (b, i, hp)),
            scratch_shapes=[
                pltpu.VMEM((group, tq, 1), jnp.float32),         # running max
                pltpu.VMEM((group, tq, 1), jnp.float32),         # running denom
                pltpu.VMEM((group, tq, dim_head), jnp.float32),  # running numer
            ],
        ),
        compiler_params=pltpu.CompilerParams(
            dimension_semantics=("parallel", "parallel", "parallel", "arbitrary"),
        ),
        cost_estimate=cost,
    )(qkv, qkv, qkv)

    if Np != N:
        out = out[:, :N, :]
    return out


# ---------------------------------------------------------------------------
# Full Attention forward
# ---------------------------------------------------------------------------
def attention_forward(x, w_qkv, w_out, b_out, *, heads, dim_head):
    """x: (B, N, dim); w_qkv: (dim, 3*heads*dim_head); w_out: (heads*dim_head, dim)."""
    B, N, D = x.shape
    inner = heads * dim_head
    M = B * N

    # to_qkv (Linear, no bias)
    qkv = linear(x.reshape(M, D), w_qkv, None)                 # (M, 3*inner)

    # softmax(q k^T * scale) @ v, q/k/v read straight from the qkv buffer.
    o = attention_core(qkv.reshape(B, N, 3 * inner),
                       heads=heads, dim_head=dim_head,
                       scale=dim_head ** (-0.5))                # (B, N, inner)

    # to_out (Linear + Dropout(0.0) -> identity)
    out = linear(o.reshape(M, inner), w_out, b_out)             # (M, D)
    return out.reshape(B, N, D)


# ---------------------------------------------------------------------------
# Pure-JAX reference (mirrors the PyTorch forward)
# ---------------------------------------------------------------------------
def attention_reference(x, w_qkv, w_out, b_out, *, heads, dim_head):
    B, N, D = x.shape
    inner = heads * dim_head
    qkv = jnp.einsum("bnd,de->bne", x, w_qkv)
    q, k, v = jnp.split(qkv, 3, axis=-1)

    def rsh(t):
        return t.reshape(B, N, heads, dim_head).transpose(0, 2, 1, 3)

    q, k, v = rsh(q), rsh(k), rsh(v)
    dots = jnp.einsum("bhid,bhjd->bhij", q, k) * (dim_head ** (-0.5))
    attn = jax.nn.softmax(dots, axis=-1)
    o = jnp.einsum("bhij,bhjd->bhid", attn, v)
    o = o.transpose(0, 2, 1, 3).reshape(B, N, inner)
    return jnp.einsum("bni,id->bnd", o, w_out) + b_out


if __name__ == "__main__":
    # Small but tile-friendly shapes: batch=2, seq=64, dim=128, 2 heads of 64.
    B, N, D = 2, 64, 128
    heads, dim_head = 2, 64
    inner = heads * dim_head

    key = jax.random.PRNGKey(0)
    kx, kq, ko, kb = jax.random.split(key, 4)
    x = jax.random.normal(kx, (B, N, D), dtype=jnp.float32)
    w_qkv = jax.random.normal(kq, (D, 3 * inner), dtype=jnp.float32) * (D ** -0.5)
    w_out = jax.random.normal(ko, (inner, D), dtype=jnp.float32) * (inner ** -0.5)
    b_out = jax.random.normal(kb, (D,), dtype=jnp.float32) * 0.02

    fwd = jax.jit(functools.partial(attention_forward, heads=heads, dim_head=dim_head))

    out = jax.block_until_ready(fwd(x, w_qkv, w_out, b_out))
    ref = attention_reference(x, w_qkv, w_out, b_out, heads=heads, dim_head=dim_head)
    assert out.shape == (B, N, D)
    # The flash kernel feeds bf16 operands to the MXU (perf review item), so the
    # f32-input path carries ~1e-2-level deviations vs the exact f32 reference.
    max_err = float(jnp.max(jnp.abs(out - ref)))
    assert jnp.allclose(out, ref, atol=7.5e-2, rtol=5e-2), max_err

    # Reduced-HBM-traffic bf16 input path (v6e/v7x):
    out_bf16 = jax.block_until_ready(
        fwd(x.astype(jnp.bfloat16), w_qkv.astype(jnp.bfloat16),
            w_out.astype(jnp.bfloat16), b_out.astype(jnp.bfloat16)))
    assert out_bf16.shape == (B, N, D)
    assert jnp.allclose(out_bf16.astype(jnp.float32), ref, atol=0.25, rtol=0.0)

    print("KERNEL_OK")
</pallas_src>

<mosaic_0001>
module attributes {stable_mosaic.version = 11 : i64} {
  func.func @_linear_kernel(%arg0: i32, %arg1: i32, %arg2: i32, %arg3: memref<128x128xf32, #tpu.memory_space<vmem>>, %arg4: memref<128x384xf32, #tpu.memory_space<vmem>>, %arg5: memref<128x384xf32, #tpu.memory_space<vmem>>, %arg6: memref<128x384xf32, #tpu.memory_space<vmem>>) attributes {dimension_semantics = [#tpu.dimension_semantics<parallel>, #tpu.dimension_semantics<parallel>, #tpu.dimension_semantics<arbitrary>], iteration_bounds = array<i64: 1, 1, 1>, scalar_prefetch = 0 : i64, scratch_operands = 1 : i64, tpu.core_type = #tpu.core_type<tc>, window_params = [{transform_indices = @transform_0, window_bounds = array<i64: 128, 128>}, {transform_indices = @transform_1, window_bounds = array<i64: 128, 384>}, {transform_indices = @transform_2, window_bounds = array<i64: 128, 384>}]} {
    %c0_i32 = arith.constant 0 : i32
    %0 = arith.cmpi eq, %arg2, %c0_i32 : i32
    %1 = arith.extui %0 : i1 to i32
    %c0_i32_0 = arith.constant 0 : i32
    %2 = arith.cmpi ne, %1, %c0_i32_0 : i32
    scf.if %2 {
      %cst_10 = arith.constant 0.000000e+00 : f32
      %12 = vector.broadcast %cst_10 : f32 to vector<128x384xf32>
      %c0_11 = arith.constant 0 : index
      %c0_12 = arith.constant 0 : index
      %13 = vector.load %arg6[%c0_11, %c0_12] : memref<128x384xf32, #tpu.memory_space<vmem>>, vector<128x384xf32>
      tpu.vector_store %arg6[%c0_11, %c0_12], %12 {strides = array<i32>} : memref<128x384xf32, #tpu.memory_space<vmem>>, vector<128x384xf32>,
    } else {
    }
    %c0 = arith.constant 0 : index
    %c0_1 = arith.constant 0 : index
    %3 = vector.load %arg6[%c0, %c0_1] : memref<128x384xf32, #tpu.memory_space<vmem>>, vector<128x384xf32>
    %c0_2 = arith.constant 0 : index
    %c0_3 = arith.constant 0 : index
    %4 = vector.load %arg3[%c0_2, %c0_3] : memref<128x128xf32, #tpu.memory_space<vmem>>, vector<128x128xf32>
    %c0_4 = arith.constant 0 : index
    %c0_5 = arith.constant 0 : index
    %5 = vector.load %arg4[%c0_4, %c0_5] : memref<128x384xf32, #tpu.memory_space<vmem>>, vector<128x384xf32>
    %cst = arith.constant dense<0.000000e+00> : vector<128x384xf32>
    %6 = tpu.matmul %4, %5, %cst {dimension_numbers = #tpu.dot_dimension_numbers<[1], [0], [0], [1], [0, 0, 1, 1], [], []>} : vector<128x128xf32>, vector<128x384xf32>, vector<128x384xf32> -> vector<128x384xf32>
    %7 = arith.addf %3, %6 : vector<128x384xf32>
    %c0_6 = arith.constant 0 : index
    %c0_7 = arith.constant 0 : index
    %8 = vector.load %arg6[%c0_6, %c0_7] : memref<128x384xf32, #tpu.memory_space<vmem>>, vector<128x384xf32>
    tpu.vector_store %arg6[%c0_6, %c0_7], %7 {strides = array<i32>} : memref<128x384xf32, #tpu.memory_space<vmem>>, vector<128x384xf32>,
    %c0_i32_8 = arith.constant 0 : i32
    %9 = arith.cmpi eq, %arg2, %c0_i32_8 : i32
    %10 = arith.extui %9 : i1 to i32
    %c0_i32_9 = arith.constant 0 : i32
    %11 = arith.cmpi ne, %10, %c0_i32_9 : i32
    scf.if %11 {
      %c0_10 = arith.constant 0 : index
      %c0_11 = arith.constant 0 : index
      %12 = vector.load %arg6[%c0_10, %c0_11] : memref<128x384xf32, #tpu.memory_space<vmem>>, vector<128x384xf32>
      %c0_12 = arith.constant 0 : index
      %c0_13 = arith.constant 0 : index
      %13 = vector.load %arg5[%c0_12, %c0_13] : memref<128x384xf32, #tpu.memory_space<vmem>>, vector<128x384xf32>
      tpu.vector_store %arg5[%c0_12, %c0_13], %12 {strides = array<i32>} : memref<128x384xf32, #tpu.memory_space<vmem>>, vector<128x384xf32>,
    } else {
    }
    return
  }
  func.func @transform_0(%arg0: i32, %arg1: i32, %arg2: i32) -> (i32, i32) {
    %c0_i32 = arith.constant 0 : i32
    return %arg0, %arg2 : i32, i32
  }
  func.func @transform_1(%arg0: i32, %arg1: i32, %arg2: i32) -> (i32, i32) {
    %c0_i32 = arith.constant 0 : i32
    return %arg2, %arg1 : i32, i32
  }
  func.func @transform_2(%arg0: i32, %arg1: i32, %arg2: i32) -> (i32, i32) {
    %c0_i32 = arith.constant 0 : i32
    return %arg0, %arg1 : i32, i32
  }
}

module attributes {stable_mosaic.version = 11 : i64} {
  func.func @_linear_kernel(%arg0: i32, %arg1: i32, %arg2: i32, %arg3: memref<128x128xf32, #tpu.memory_space<vmem>>, %arg4: memref<128x128xf32, #tpu.memory_space<vmem>>, %arg5: memref<1x128xf32, #tpu.memory_space<vmem>>, %arg6: memref<128x128xf32, #tpu.memory_space<vmem>>, %arg7: memref<128x128xf32, #tpu.memory_space<vmem>>) attributes {dimension_semantics = [#tpu.dimension_semantics<parallel>, #tpu.dimension_semantics<parallel>, #tpu.dimension_semantics<arbitrary>], iteration_bounds = array<i64: 1, 1, 1>, scalar_prefetch = 0 : i64, scratch_operands = 1 : i64, tpu.core_type = #tpu.core_type<tc>, window_params = [{transform_indices = @transform_0, window_bounds = array<i64: 128, 128>}, {transform_indices = @transform_1, window_bounds = array<i64: 128, 128>}, {transform_indices = @transform_2, window_bounds = array<i64: 1, 128>}, {transform_indices = @transform_3, window_bounds = array<i64: 128, 128>}]} {
    %c0_i32 = arith.constant 0 : i32
    %0 = arith.cmpi eq, %arg2, %c0_i32 : i32
    %1 = arith.extui %0 : i1 to i32
    %c0_i32_0 = arith.constant 0 : i32
    %2 = arith.cmpi ne, %1, %c0_i32_0 : i32
    scf.if %2 {
      %cst_10 = arith.constant 0.000000e+00 : f32
      %12 = vector.broadcast %cst_10 : f32 to vector<128x128xf32>
      %c0_11 = arith.constant 0 : index
      %c0_12 = arith.constant 0 : index
      %13 = vector.load %arg7[%c0_11, %c0_12] : memref<128x128xf32, #tpu.memory_space<vmem>>, vector<128x128xf32>
      tpu.vector_store %arg7[%c0_11, %c0_12], %12 {strides = array<i32>} : memref<128x128xf32, #tpu.memory_space<vmem>>, vector<128x128xf32>,
    } else {
    }
    %c0 = arith.constant 0 : index
    %c0_1 = arith.constant 0 : index
    %3 = vector.load %arg7[%c0, %c0_1] : memref<128x128xf32, #tpu.memory_space<vmem>>, vector<128x128xf32>
    %c0_2 = arith.constant 0 : index
    %c0_3 = arith.constant 0 : index
    %4 = vector.load %arg3[%c0_2, %c0_3] : memref<128x128xf32, #tpu.memory_space<vmem>>, vector<128x128xf32>
    %c0_4 = arith.constant 0 : index
    %c0_5 = arith.constant 0 : index
    %5 = vector.load %arg4[%c0_4, %c0_5] : memref<128x128xf32, #tpu.memory_space<vmem>>, vector<128x128xf32>
    %cst = arith.constant dense<0.000000e+00> : vector<128x128xf32>
    %6 = tpu.matmul %4, %5, %cst {dimension_numbers = #tpu.dot_dimension_numbers<[1], [0], [0], [1], [0, 0, 1, 1], [], []>} : vector<128x128xf32>, vector<128x128xf32>, vector<128x128xf32> -> vector<128x128xf32>
    %7 = arith.addf %3, %6 : vector<128x128xf32>
    %c0_6 = arith.constant 0 : index
    %c0_7 = arith.constant 0 : index
    %8 = vector.load %arg7[%c0_6, %c0_7] : memref<128x128xf32, #tpu.memory_space<vmem>>, vector<128x128xf32>
    tpu.vector_store %arg7[%c0_6, %c0_7], %7 {strides = array<i32>} : memref<128x128xf32, #tpu.memory_space<vmem>>, vector<128x128xf32>,
    %c0_i32_8 = arith.constant 0 : i32
    %9 = arith.cmpi eq, %arg2, %c0_i32_8 : i32
    %10 = arith.extui %9 : i1 to i32
    %c0_i32_9 = arith.constant 0 : i32
    %11 = arith.cmpi ne, %10, %c0_i32_9 : i32
    scf.if %11 {
      %c0_10 = arith.constant 0 : index
      %c0_11 = arith.constant 0 : index
      %12 = vector.load %arg7[%c0_10, %c0_11] : memref<128x128xf32, #tpu.memory_space<vmem>>, vector<128x128xf32>
      %c0_12 = arith.constant 0 : index
      %c0_13 = arith.constant 0 : index
      %13 = vector.load %arg5[%c0_12, %c0_13] : memref<1x128xf32, #tpu.memory_space<vmem>>, vector<1x128xf32>
      %14 = vector.broadcast %13 : vector<1x128xf32> to vector<128x128xf32>
      %15 = arith.addf %12, %14 : vector<128x128xf32>
      %c0_14 = arith.constant 0 : index
      %c0_15 = arith.constant 0 : index
      %16 = vector.load %arg6[%c0_14, %c0_15] : memref<128x128xf32, #tpu.memory_space<vmem>>, vector<128x128xf32>
      tpu.vector_store %arg6[%c0_14, %c0_15], %15 {strides = array<i32>} : memref<128x128xf32, #tpu.memory_space<vmem>>, vector<128x128xf32>,
    } else {
    }
    return
  }
  func.func @transform_0(%arg0: i32, %arg1: i32, %arg2: i32) -> (i32, i32) {
    %c0_i32 = arith.constant 0 : i32
    return %arg0, %arg2 : i32, i32
  }
  func.func @transform_1(%arg0: i32, %arg1: i32, %arg2: i32) -> (i32, i32) {
    %c0_i32 = arith.constant 0 : i32
    return %arg2, %arg1 : i32, i32
  }
  func.func @transform_2(%arg0: i32, %arg1: i32, %arg2: i32) -> (i32, i32) {
    %c0_i32 = arith.constant 0 : i32
    %c0_i32_0 = arith.constant 0 : i32
    return %c0_i32, %arg1 : i32, i32
  }
  func.func @transform_3(%arg0: i32, %arg1: i32, %arg2: i32) -> (i32, i32) {
    %c0_i32 = arith.constant 0 : i32
    return %arg0, %arg1 : i32, i32
  }
}

module attributes {stable_mosaic.version = 11 : i64} {
  func.func @_flash_kernel(%arg0: i32, %arg1: i32, %arg2: i32, %arg3: i32, %arg4: memref<1x64x128xf32, #tpu.memory_space<vmem>>, %arg5: memref<1x64x128xf32, #tpu.memory_space<vmem>>, %arg6: memref<1x64x128xf32, #tpu.memory_space<vmem>>, %arg7: memref<1x64x128xf32, #tpu.memory_space<vmem>>, %arg8: memref<2x64x1xf32, #tpu.memory_space<vmem>>, %arg9: memref<2x64x1xf32, #tpu.memory_space<vmem>>, %arg10: memref<2x64x64xf32, #tpu.memory_space<vmem>>) attributes {dimension_semantics = [#tpu.dimension_semantics<parallel>, #tpu.dimension_semantics<parallel>, #tpu.dimension_semantics<parallel>, #tpu.dimension_semantics<arbitrary>], iteration_bounds = array<i64: 2, 1, 1, 1>, scalar_prefetch = 0 : i64, scratch_operands = 3 : i64, tpu.core_type = #tpu.core_type<tc>, window_params = [{transform_indices = @transform_0, window_bounds = array<i64: 1, 64, 128>}, {transform_indices = @transform_1, window_bounds = array<i64: 1, 64, 128>}, {transform_indices = @transform_2, window_bounds = array<i64: 1, 64, 128>}, {transform_indices = @transform_3, window_bounds = array<i64: 1, 64, 128>}]} {
    %c0_i32 = arith.constant 0 : i32
    %0 = arith.cmpi eq, %arg3, %c0_i32 : i32
    %1 = arith.extui %0 : i1 to i32
    %c0_i32_0 = arith.constant 0 : i32
    %2 = arith.cmpi ne, %1, %c0_i32_0 : i32
    scf.if %2 {
      %cst_55 = arith.constant 0xFF800000 : f32
      %94 = vector.broadcast %cst_55 : f32 to vector<2x64x1xf32>
      %c0_56 = arith.constant 0 : index
      %c0_57 = arith.constant 0 : index
      %c0_58 = arith.constant 0 : index
      %95 = vector.load %arg8[%c0_56, %c0_57, %c0_58] : memref<2x64x1xf32, #tpu.memory_space<vmem>>, vector<2x64x1xf32>
      tpu.vector_store %arg8[%c0_56, %c0_57, %c0_58], %94 {strides = array<i32>} : memref<2x64x1xf32, #tpu.memory_space<vmem>>, vector<2x64x1xf32>,
      %cst_59 = arith.constant 0.000000e+00 : f32
      %96 = vector.broadcast %cst_59 : f32 to vector<2x64x1xf32>
      %c0_60 = arith.constant 0 : index
      %c0_61 = arith.constant 0 : index
      %c0_62 = arith.constant 0 : index
      %97 = vector.load %arg9[%c0_60, %c0_61, %c0_62] : memref<2x64x1xf32, #tpu.memory_space<vmem>>, vector<2x64x1xf32>
      tpu.vector_store %arg9[%c0_60, %c0_61, %c0_62], %96 {strides = array<i32>} : memref<2x64x1xf32, #tpu.memory_space<vmem>>, vector<2x64x1xf32>,
      %cst_63 = arith.constant 0.000000e+00 : f32
      %98 = vector.broadcast %cst_63 : f32 to vector<2x64x64xf32>
      %c0_64 = arith.constant 0 : index
      %c0_65 = arith.constant 0 : index
      %c0_66 = arith.constant 0 : index
      %99 = vector.load %arg10[%c0_64, %c0_65, %c0_66] : memref<2x64x64xf32, #tpu.memory_space<vmem>>, vector<2x64x64xf32>
      tpu.vector_store %arg10[%c0_64, %c0_65, %c0_66], %98 {strides = array<i32>} : memref<2x64x64xf32, #tpu.memory_space<vmem>>, vector<2x64x64xf32>,
    } else {
    }
    %c0 = arith.constant 0 : index
    %c0_1 = arith.constant 0 : index
    %c0_2 = arith.constant 0 : index
    %3 = vector.load %arg4[%c0, %c0_1, %c0_2] : memref<1x64x128xf32, #tpu.memory_space<vmem>>, vector<1x64x128xf32>
    %4 = vector.shape_cast %3 : vector<1x64x128xf32> to vector<64x128xf32>
    %c0_3 = arith.constant 0 : index
    %c0_4 = arith.constant 0 : index
    %c0_5 = arith.constant 0 : index
    %5 = vector.load %arg5[%c0_3, %c0_4, %c0_5] : memref<1x64x128xf32, #tpu.memory_space<vmem>>, vector<1x64x128xf32>
    %6 = vector.shape_cast %5 : vector<1x64x128xf32> to vector<64x128xf32>
    %c0_6 = arith.constant 0 : index
    %c0_7 = arith.constant 0 : index
    %c0_8 = arith.constant 0 : index
    %7 = vector.load %arg6[%c0_6, %c0_7, %c0_8] : memref<1x64x128xf32, #tpu.memory_space<vmem>>, vector<1x64x128xf32>
    %8 = vector.shape_cast %7 : vector<1x64x128xf32> to vector<64x128xf32>
    %9 = vector.extract_strided_slice %4 {offsets = [0, 0], sizes = [64, 64], strides = [1, 1]} : vector<64x128xf32> to vector<64x64xf32>
    %cst = arith.constant 1.250000e-01 : f32
    %10 = vector.broadcast %cst : f32 to vector<64x64xf32>
    %11 = arith.mulf %9, %10 : vector<64x64xf32>
    %12 = arith.truncf %11 : vector<64x64xf32> to vector<64x64xbf16>
    %13 = vector.extract_strided_slice %6 {offsets = [0, 0], sizes = [64, 64], strides = [1, 1]} : vector<64x128xf32> to vector<64x64xf32>
    %14 = arith.truncf %13 : vector<64x64xf32> to vector<64x64xbf16>
    %15 = vector.extract_strided_slice %8 {offsets = [0, 0], sizes = [64, 64], strides = [1, 1]} : vector<64x128xf32> to vector<64x64xf32>
    %16 = arith.truncf %15 : vector<64x64xf32> to vector<64x64xbf16>
    %cst_9 = arith.constant dense<0.000000e+00> : vector<64x64xf32>
    %17 = tpu.matmul %12, %14, %cst_9 {dimension_numbers = #tpu.dot_dimension_numbers<[1], [1], [0], [0], [0, 0, 1, 0], [], []>} : vector<64x64xbf16>, vector<64x64xbf16>, vector<64x64xf32> -> vector<64x64xf32>
    %c0_10 = arith.constant 0 : index
    %c0_11 = arith.constant 0 : index
    %c0_12 = arith.constant 0 : index
    %18 = vector.load %arg8[%c0_10, %c0_11, %c0_12] : memref<2x64x1xf32, #tpu.memory_space<vmem>>, vector<1x64x1xf32>
    %19 = vector.shape_cast %18 : vector<1x64x1xf32> to vector<64x1xf32>
    %cst_13 = arith.constant dense<0xFF800000> : vector<64xf32>
    %20 = vector.multi_reduction <maximumf>, %17, %cst_13 [1] : vector<64x64xf32> to vector<64xf32>
    %21 = vector.shape_cast %20 : vector<64xf32> to vector<64x1xf32>
    %22 = arith.maximumf %19, %21 : vector<64x1xf32>
    %23 = arith.subf %19, %22 : vector<64x1xf32>
    %24 = math.exp %23 : vector<64x1xf32>
    %25 = vector.broadcast %22 : vector<64x1xf32> to vector<64x64xf32>
    %26 = arith.subf %17, %25 : vector<64x64xf32>
    %27 = math.exp %26 : vector<64x64xf32>
    %c0_14 = arith.constant 0 : index
    %c0_15 = arith.constant 0 : index
    %c0_16 = arith.constant 0 : index
    %28 = vector.load %arg9[%c0_14, %c0_15, %c0_16] : memref<2x64x1xf32, #tpu.memory_space<vmem>>, vector<1x64x1xf32>
    %29 = vector.shape_cast %28 : vector<1x64x1xf32> to vector<64x1xf32>
    %30 = arith.mulf %24, %29 : vector<64x1xf32>
    %cst_17 = arith.constant dense<0.000000e+00> : vector<64xf32>
    %31 = vector.multi_reduction <add>, %27, %cst_17 [1] : vector<64x64xf32> to vector<64xf32>
    %32 = vector.shape_cast %31 : vector<64xf32> to vector<64x1xf32>
    %33 = arith.addf %30, %32 : vector<64x1xf32>
    %c0_18 = arith.constant 0 : index
    %c0_19 = arith.constant 0 : index
    %c0_20 = arith.constant 0 : index
    %34 = vector.load %arg9[%c0_18, %c0_19, %c0_20] : memref<2x64x1xf32, #tpu.memory_space<vmem>>, vector<1x64x1xf32>
    %35 = vector.shape_cast %34 : vector<1x64x1xf32> to vector<64x1xf32>
    %36 = vector.shape_cast %33 : vector<64x1xf32> to vector<1x64x1xf32>
    tpu.vector_store %arg9[%c0_18, %c0_19, %c0_20], %36 {strides = array<i32>} : memref<2x64x1xf32, #tpu.memory_space<vmem>>, vector<1x64x1xf32>,
    %c0_21 = arith.constant 0 : index
    %c0_22 = arith.constant 0 : index
    %c0_23 = arith.constant 0 : index
    %37 = vector.load %arg10[%c0_21, %c0_22, %c0_23] : memref<2x64x64xf32, #tpu.memory_space<vmem>>, vector<1x64x64xf32>
    %38 = vector.shape_cast %37 : vector<1x64x64xf32> to vector<64x64xf32>
    %39 = vector.broadcast %24 : vector<64x1xf32> to vector<64x64xf32>
    %40 = arith.mulf %39, %38 : vector<64x64xf32>
    %41 = arith.truncf %27 : vector<64x64xf32> to vector<64x64xbf16>
    %cst_24 = arith.constant dense<0.000000e+00> : vector<64x64xf32>
    %42 = tpu.matmul %41, %16, %cst_24 {dimension_numbers = #tpu.dot_dimension_numbers<[1], [0], [0], [1], [0, 0, 1, 1], [], []>} : vector<64x64xbf16>, vector<64x64xbf16>, vector<64x64xf32> -> vector<64x64xf32>
    %43 = arith.addf %40, %42 : vector<64x64xf32>
    %c0_25 = arith.constant 0 : index
    %c0_26 = arith.constant 0 : index
    %c0_27 = arith.constant 0 : index
    %44 = vector.load %arg10[%c0_25, %c0_26, %c0_27] : memref<2x64x64xf32, #tpu.memory_space<vmem>>, vector<1x64x64xf32>
    %45 = vector.shape_cast %44 : vector<1x64x64xf32> to vector<64x64xf32>
    %46 = vector.shape_cast %43 : vector<64x64xf32> to vector<1x64x64xf32>
    tpu.vector_store %arg10[%c0_25, %c0_26, %c0_27], %46 {strides = array<i32>} : memref<2x64x64xf32, #tpu.memory_space<vmem>>, vector<1x64x64xf32>,
    %c0_28 = arith.constant 0 : index
    %c0_29 = arith.constant 0 : index
    %c0_30 = arith.constant 0 : index
    %47 = vector.load %arg8[%c0_28, %c0_29, %c0_30] : memref<2x64x1xf32, #tpu.memory_space<vmem>>, vector<1x64x1xf32>
    %48 = vector.shape_cast %47 : vector<1x64x1xf32> to vector<64x1xf32>
    %49 = vector.shape_cast %22 : vector<64x1xf32> to vector<1x64x1xf32>
    tpu.vector_store %arg8[%c0_28, %c0_29, %c0_30], %49 {strides = array<i32>} : memref<2x64x1xf32, #tpu.memory_space<vmem>>, vector<1x64x1xf32>,
    %50 = vector.extract_strided_slice %4 {offsets = [0, 64], sizes = [64, 64], strides = [1, 1]} : vector<64x128xf32> to vector<64x64xf32>
    %cst_31 = arith.constant 1.250000e-01 : f32
    %51 = vector.broadcast %cst_31 : f32 to vector<64x64xf32>
    %52 = arith.mulf %50, %51 : vector<64x64xf32>
    %53 = arith.truncf %52 : vector<64x64xf32> to vector<64x64xbf16>
    %54 = vector.extract_strided_slice %6 {offsets = [0, 64], sizes = [64, 64], strides = [1, 1]} : vector<64x128xf32> to vector<64x64xf32>
    %55 = arith.truncf %54 : vector<64x64xf32> to vector<64x64xbf16>
    %56 = vector.extract_strided_slice %8 {offsets = [0, 64], sizes = [64, 64], strides = [1, 1]} : vector<64x128xf32> to vector<64x64xf32>
    %57 = arith.truncf %56 : vector<64x64xf32> to vector<64x64xbf16>
    %cst_32 = arith.constant dense<0.000000e+00> : vector<64x64xf32>
    %58 = tpu.matmul %53, %55, %cst_32 {dimension_numbers = #tpu.dot_dimension_numbers<[1], [1], [0], [0], [0, 0, 1, 0], [], []>} : vector<64x64xbf16>, vector<64x64xbf16>, vector<64x64xf32> -> vector<64x64xf32>
    %c1 = arith.constant 1 : index
    %c0_33 = arith.constant 0 : index
    %c0_34 = arith.constant 0 : index
    %59 = vector.load %arg8[%c1, %c0_33, %c0_34] : memref<2x64x1xf32, #tpu.memory_space<vmem>>, vector<1x64x1xf32>
    %60 = vector.shape_cast %59 : vector<1x64x1xf32> to vector<64x1xf32>
    %cst_35 = arith.constant dense<0xFF800000> : vector<64xf32>
    %61 = vector.multi_reduction <maximumf>, %58, %cst_35 [1] : vector<64x64xf32> to vector<64xf32>
    %62 = vector.shape_cast %61 : vector<64xf32> to vector<64x1xf32>
    %63 = arith.maximumf %60, %62 : vector<64x1xf32>
    %64 = arith.subf %60, %63 : vector<64x1xf32>
    %65 = math.exp %64 : vector<64x1xf32>
    %66 = vector.broadcast %63 : vector<64x1xf32> to vector<64x64xf32>
    %67 = arith.subf %58, %66 : vector<64x64xf32>
    %68 = math.exp %67 : vector<64x64xf32>
    %c1_36 = arith.constant 1 : index
    %c0_37 = arith.constant 0 : index
    %c0_38 = arith.constant 0 : index
    %69 = vector.load %arg9[%c1_36, %c0_37, %c0_38] : memref<2x64x1xf32, #tpu.memory_space<vmem>>, vector<1x64x1xf32>
    %70 = vector.shape_cast %69 : vector<1x64x1xf32> to vector<64x1xf32>
    %71 = arith.mulf %65, %70 : vector<64x1xf32>
    %cst_39 = arith.constant dense<0.000000e+00> : vector<64xf32>
    %72 = vector.multi_reduction <add>, %68, %cst_39 [1] : vector<64x64xf32> to vector<64xf32>
    %73 = vector.shape_cast %72 : vector<64xf32> to vector<64x1xf32>
    %74 = arith.addf %71, %73 : vector<64x1xf32>
    %c1_40 = arith.constant 1 : index
    %c0_41 = arith.constant 0 : index
    %c0_42 = arith.constant 0 : index
    %75 = vector.load %arg9[%c1_40, %c0_41, %c0_42] : memref<2x64x1xf32, #tpu.memory_space<vmem>>, vector<1x64x1xf32>
    %76 = vector.shape_cast %75 : vector<1x64x1xf32> to vector<64x1xf32>
    %77 = vector.shape_cast %74 : vector<64x1xf32> to vector<1x64x1xf32>
    tpu.vector_store %arg9[%c1_40, %c0_41, %c0_42], %77 {strides = array<i32>} : memref<2x64x1xf32, #tpu.memory_space<vmem>>, vector<1x64x1xf32>,
    %c1_43 = arith.constant 1 : index
    %c0_44 = arith.constant 0 : index
    %c0_45 = arith.constant 0 : index
    %78 = vector.load %arg10[%c1_43, %c0_44, %c0_45] : memref<2x64x64xf32, #tpu.memory_space<vmem>>, vector<1x64x64xf32>
    %79 = vector.shape_cast %78 : vector<1x64x64xf32> to vector<64x64xf32>
    %80 = vector.broadcast %65 : vector<64x1xf32> to vector<64x64xf32>
    %81 = arith.mulf %80, %79 : vector<64x64xf32>
    %82 = arith.truncf %68 : vector<64x64xf32> to vector<64x64xbf16>
    %cst_46 = arith.constant dense<0.000000e+00> : vector<64x64xf32>
    %83 = tpu.matmul %82, %57, %cst_46 {dimension_numbers = #tpu.dot_dimension_numbers<[1], [0], [0], [1], [0, 0, 1, 1], [], []>} : vector<64x64xbf16>, vector<64x64xbf16>, vector<64x64xf32> -> vector<64x64xf32>
    %84 = arith.addf %81, %83 : vector<64x64xf32>
    %c1_47 = arith.constant 1 : index
    %c0_48 = arith.constant 0 : index
    %c0_49 = arith.constant 0 : index
    %85 = vector.load %arg10[%c1_47, %c0_48, %c0_49] : memref<2x64x64xf32, #tpu.memory_space<vmem>>, vector<1x64x64xf32>
    %86 = vector.shape_cast %85 : vector<1x64x64xf32> to vector<64x64xf32>
    %87 = vector.shape_cast %84 : vector<64x64xf32> to vector<1x64x64xf32>
    tpu.vector_store %arg10[%c1_47, %c0_48, %c0_49], %87 {strides = array<i32>} : memref<2x64x64xf32, #tpu.memory_space<vmem>>, vector<1x64x64xf32>,
    %c1_50 = arith.constant 1 : index
    %c0_51 = arith.constant 0 : index
    %c0_52 = arith.constant 0 : index
    %88 = vector.load %arg8[%c1_50, %c0_51, %c0_52] : memref<2x64x1xf32, #tpu.memory_space<vmem>>, vector<1x64x1xf32>
    %89 = vector.shape_cast %88 : vector<1x64x1xf32> to vector<64x1xf32>
    %90 = vector.shape_cast %63 : vector<64x1xf32> to vector<1x64x1xf32>
    tpu.vector_store %arg8[%c1_50, %c0_51, %c0_52], %90 {strides = array<i32>} : memref<2x64x1xf32, #tpu.memory_space<vmem>>, vector<1x64x1xf32>,
    %c0_i32_53 = arith.constant 0 : i32
    %91 = arith.cmpi eq, %arg3, %c0_i32_53 : i32
    %92 = arith.extui %91 : i1 to i32
    %c0_i32_54 = arith.constant 0 : i32
    %93 = arith.cmpi ne, %92, %c0_i32_54 : i32
    scf.if %93 {
      %c0_55 = arith.constant 0 : index
      %c0_56 = arith.constant 0 : index
      %c0_57 = arith.constant 0 : index
      %94 = vector.load %arg9[%c0_55, %c0_56, %c0_57] : memref<2x64x1xf32, #tpu.memory_space<vmem>>, vector<1x64x1xf32>
      %95 = vector.shape_cast %94 : vector<1x64x1xf32> to vector<64x1xf32>
      %96 = tpu.reciprocal %95 {approx = true} : vector<64x1xf32> -> vector<64x1xf32>
      %c0_58 = arith.constant 0 : index
      %c0_59 = arith.constant 0 : index
      %c0_60 = arith.constant 0 : index
      %97 = vector.load %arg10[%c0_58, %c0_59, %c0_60] : memref<2x64x64xf32, #tpu.memory_space<vmem>>, vector<1x64x64xf32>
      %98 = vector.shape_cast %97 : vector<1x64x64xf32> to vector<64x64xf32>
      %99 = vector.broadcast %96 : vector<64x1xf32> to vector<64x64xf32>
      %100 = arith.mulf %98, %99 : vector<64x64xf32>
      %c1_61 = arith.constant 1 : index
      %c0_62 = arith.constant 0 : index
      %c0_63 = arith.constant 0 : index
      %101 = vector.load %arg9[%c1_61, %c0_62, %c0_63] : memref<2x64x1xf32, #tpu.memory_space<vmem>>, vector<1x64x1xf32>
      %102 = vector.shape_cast %101 : vector<1x64x1xf32> to vector<64x1xf32>
      %103 = tpu.reciprocal %102 {approx = true} : vector<64x1xf32> -> vector<64x1xf32>
      %c1_64 = arith.constant 1 : index
      %c0_65 = arith.constant 0 : index
      %c0_66 = arith.constant 0 : index
      %104 = vector.load %arg10[%c1_64, %c0_65, %c0_66] : memref<2x64x64xf32, #tpu.memory_space<vmem>>, vector<1x64x64xf32>
      %105 = vector.shape_cast %104 : vector<1x64x64xf32> to vector<64x64xf32>
      %106 = vector.broadcast %103 : vector<64x1xf32> to vector<64x64xf32>
      %107 = arith.mulf %105, %106 : vector<64x64xf32>
      %108 = tpu.concatenate %100, %107 in 1 : vector<64x64xf32>, vector<64x64xf32> -> vector<64x128xf32>
      %c0_67 = arith.constant 0 : index
      %c0_68 = arith.constant 0 : index
      %c0_69 = arith.constant 0 : index
      %109 = vector.load %arg7[%c0_67, %c0_68, %c0_69] : memref<1x64x128xf32, #tpu.memory_space<vmem>>, vector<1x64x128xf32>
      %110 = vector.shape_cast %109 : vector<1x64x128xf32> to vector<64x128xf32>
      %111 = vector.shape_cast %108 : vector<64x128xf32> to vector<1x64x128xf32>
      tpu.vector_store %arg7[%c0_67, %c0_68, %c0_69], %111 {strides = array<i32>} : memref<1x64x128xf32, #tpu.memory_space<vmem>>, vector<1x64x128xf32>,
    } else {
    }
    return
  }
  func.func @transform_0(%arg0: i32, %arg1: i32, %arg2: i32, %arg3: i32) -> (i32, i32, i32) {
    %c0_i32 = arith.constant 0 : i32
    return %arg0, %arg2, %arg1 : i32, i32, i32
  }
  func.func @transform_1(%arg0: i32, %arg1: i32, %arg2: i32, %arg3: i32) -> (i32, i32, i32) {
    %c1_i32 = arith.constant 1 : i32
    %0 = arith.addi %c1_i32, %arg1 : i32
    %c0_i32 = arith.constant 0 : i32
    return %arg0, %arg3, %0 : i32, i32, i32
  }
  func.func @transform_2(%arg0: i32, %arg1: i32, %arg2: i32, %arg3: i32) -> (i32, i32, i32) {
    %c2_i32 = arith.constant 2 : i32
    %0 = arith.addi %c2_i32, %arg1 : i32
    %c0_i32 = arith.constant 0 : i32
    return %arg0, %arg3, %0 : i32, i32, i32
  }
  func.func @transform_3(%arg0: i32, %arg1: i32, %arg2: i32, %arg3: i32) -> (i32, i32, i32) {
    %c0_i32 = arith.constant 0 : i32
    return %arg0, %arg2, %arg1 : i32, i32, i32
  }
}

</mosaic_0001>

<bundles_post_ra>
// kernel: attention_forward.5
= control target key start
LH: loop header
LB: loop body
LE: loop exit
PB: predicated region body
PF: predicated region fallthrough
CT: control target
= control target key end

     0   :  { %s605_s0 = inlined_call_operand.vmem [shape: f32[128,128], index: 0, kind: input, shape index: {}]   ;;  %s606_s1 = inlined_call_operand.vmem [shape: f32[128,128], index: 1, kind: input, shape index: {}]   ;;  %s607_s2 = inlined_call_operand.vmem [shape: f32[1,128], index: 2, kind: input, shape index: {}]   ;;  %s608_s3 = inlined_call_operand.hbm [shape: f32[128,128], index: 3, kind: output, shape index: {}]  }
   0x1   :  { %v82_v0 = vld [vmem:[%s606_s1 + $0x78] sm:$0xff]  ;;  %v81_v1 = vld [vmem:[%s606_s1 + $0x70] sm:$0xff]  ;;  %v80_v2 = vld [vmem:[%s606_s1 + $0x68] sm:$0xff] }
   0x2   :  { %367 = vmatprep.subr.mxu0 %v82_v0  ;;  %423 = vmatprep.subr.mxu1 %v82_v0  ;;  %v79_v3 = vld [vmem:[%s606_s1 + $0x60] sm:$0xff]  ;;  %v78_v4 = vld [vmem:[%s606_s1 + $0x58] sm:$0xff]  ;;  %v77_v5 = vld [vmem:[%s606_s1 + $0x50] sm:$0xff] }
   0x3   :  { %368 = vmatpush3.msra.mxu0 %v82_v0  ;;  %439 = vmatpush3.msra.mxu1 %v82_v0  ;;  %v76_v6 = vld [vmem:[%s606_s1 + $0x48] sm:$0xff] }
   0x4   :  { %369 = vmatprep.subr.mxu0 %v81_v1  ;;  %424 = vmatprep.subr.mxu1 %v81_v1 }
   0x5   :  { %370 = vmatpush3.msra.mxu0 %v81_v1  ;;  %440 = vmatpush3.msra.mxu1 %v81_v1 }
   0x6   :  { %371 = vmatprep.subr.mxu0 %v80_v2  ;;  %425 = vmatprep.subr.mxu1 %v80_v2 }
   0x7   :  { %372 = vmatpush3.msra.mxu0 %v80_v2  ;;  %441 = vmatpush3.msra.mxu1 %v80_v2 }
   0x8   :  { %373 = vmatprep.subr.mxu0 %v79_v3  ;;  %426 = vmatprep.subr.mxu1 %v79_v3 }
   0x9   :  { %374 = vmatpush3.msra.mxu0 %v79_v3  ;;  %442 = vmatpush3.msra.mxu1 %v79_v3 }
   0xa   :  { %375 = vmatprep.subr.mxu0 %v78_v4  ;;  %427 = vmatprep.subr.mxu1 %v78_v4 }
   0xb   :  { %376 = vmatpush3.msra.mxu0 %v78_v4  ;;  %443 = vmatpush3.msra.mxu1 %v78_v4 }
   0xc   :  { %8 = vsyncpa [#allocation4], 0  ;;  %377 = vmatprep.subr.mxu0 %v77_v5  ;;  %428 = vmatprep.subr.mxu1 %v77_v5  ;;  %v75_v7 = vld [vmem:[%s606_s1 + $0x40] sm:$0xff]  ;;  %v74_v8 = vld [vmem:[%s606_s1 + $0x38] sm:$0xff] }
   0xd   :  { %378 = vmatpush3.msra.mxu0 %v77_v5  ;;  %444 = vmatpush3.msra.mxu1 %v77_v5  ;;  %v73_v9 = vld [vmem:[%s606_s1 + $0x30] sm:$0xff]  ;;  %v72_v10 = vld [vmem:[%s606_s1 + $0x28] sm:$0xff]  ;;  %v71_v11 = vld [vmem:[%s606_s1 + $0x20] sm:$0xff] }
   0xe   :  { %379 = vmatprep.subr.mxu0 %v76_v6  ;;  %429 = vmatprep.subr.mxu1 %v76_v6  ;;  %v70_v12 = vld [vmem:[%s606_s1 + $0x18] sm:$0xff]  ;;  %v69_v13 = vld [vmem:[%s606_s1 + $0x10] sm:$0xff]  ;;  %v68_v14 = vld [vmem:[%s606_s1 + $0x8] sm:$0xff] }
   0xf   :  { %380 = vmatpush3.msra.mxu0 %v76_v6  ;;  %445 = vmatpush3.msra.mxu1 %v76_v6  ;;  %v67_v15 = vld [vmem:[%s606_s1] sm:$0xff]  ;;  %v52_v18 = vld [vmem:[%s605_s0 + $0x8] sm:$0xff]  ;;  %v53_v20 = vld [vmem:[%s605_s0 + $0x10] sm:$0xff] }
  0x10   :  { %381 = vmatprep.subr.mxu0 %v75_v7  ;;  %430 = vmatprep.subr.mxu1 %v75_v7  ;;  %v51_v16 = vld [vmem:[%s605_s0] sm:$0xff]  ;;  %v60_v19 = vld [vmem:[%s605_s0 + $0x48] sm:$0xff]  ;;  %v61_v21 = vld [vmem:[%s605_s0 + $0x50] sm:$0xff] }
  0x11   :  { %382 = vmatpush3.msra.mxu0 %v75_v7  ;;  %446 = vmatpush3.msra.mxu1 %v75_v7  ;;  %v59_v17 = vld [vmem:[%s605_s0 + $0x40] sm:$0xff]  ;;  %v54_v22 = vld [vmem:[%s605_s0 + $0x18] sm:$0xff]  ;;  %v56_v26 = vld [vmem:[%s605_s0 + $0x28] sm:$0xff] }
  0x12   :  { %383 = vmatprep.subr.mxu0 %v74_v8  ;;  %431 = vmatprep.subr.mxu1 %v74_v8  ;;  %v62_v23 = vld [vmem:[%s605_s0 + $0x58] sm:$0xff]  ;;  %v55_v24 = vld [vmem:[%s605_s0 + $0x20] sm:$0xff]  ;;  %v64_v27 = vld [vmem:[%s605_s0 + $0x68] sm:$0xff] }
  0x13   :  { %384 = vmatpush3.msra.mxu0 %v74_v8  ;;  %447 = vmatpush3.msra.mxu1 %v74_v8  ;;  %v63_v25 = vld [vmem:[%s605_s0 + $0x60] sm:$0xff]  ;;  %v57_v28 = vld [vmem:[%s605_s0 + $0x30] sm:$0xff]  ;;  %v58_v30 = vld [vmem:[%s605_s0 + $0x38] sm:$0xff] }
  0x14   :  { %385 = vmatprep.subr.mxu0 %v73_v9  ;;  %432 = vmatprep.subr.mxu1 %v73_v9  ;;  %v65_v29 = vld [vmem:[%s605_s0 + $0x70] sm:$0xff]  ;;  %v66_v31 = vld [vmem:[%s605_s0 + $0x78] sm:$0xff]  ;;  %v334_v32 = vld [vmem:[%s607_s2] ss:$0 sm:$0xff]  ;;  %s480_s0 = smov [#allocation3]  }
  0x15   :  { %386 = vmatpush3.msra.mxu0 %v73_v9  ;;  %448 = vmatpush3.msra.mxu1 %v73_v9  ;;  %s323_s2 = sshll.u32 %s480_s0, 4  ;;  %s324_s2 = int_to_ptr.vmem [resolvable:$true] %s323_s2 }
  0x16   :  { %387 = vmatprep.subr.mxu0 %v72_v10  ;;  %433 = vmatprep.subr.mxu1 %v72_v10  ;;  %s458_s23 = scalar_lea.vmem %s324_s2, 2048  ;;  %p463_p1 = scmp.lt.s32.totalorder %s324_s2, %s324_s2 }
  0x17   :  { %388 = vmatpush3.msra.mxu0 %v72_v10  ;;  %449 = vmatpush3.msra.mxu1 %v72_v10  ;;  %p459_p0 = scmp.ne.s32.totalorder %s324_s2, %s458_s23  ;;  %p464_p2 = scmp.lt.s32.totalorder %s458_s23, %s458_s23 }
  0x18   :  { %389 = vmatprep.subr.mxu0 %v71_v11  ;;  %434 = vmatprep.subr.mxu1 %v71_v11 }
  0x19   :  { %390 = vmatpush3.msra.mxu0 %v71_v11  ;;  %450 = vmatpush3.msra.mxu1 %v71_v11  ;;  %p465_p3 = por %p464_p2, %p463_p1 }
  0x1a   :  { %391 = vmatprep.subr.mxu0 %v70_v12  ;;  %435 = vmatprep.subr.mxu1 %v70_v12 }
  0x1b   :  { %392 = vmatpush3.msra.mxu0 %v70_v12  ;;  %451 = vmatpush3.msra.mxu1 %v70_v12  ;;  %p466_p4 = pnand %p465_p3, %p459_p0 }
  0x1c   :  { %393 = vmatprep.subr.mxu0 %v69_v13  ;;  %436 = vmatprep.subr.mxu1 %v69_v13 }
  0x1d   :  { %394 = vmatpush3.msra.mxu0 %v69_v13  ;;  %452 = vmatpush3.msra.mxu1 %v69_v13 }
  0x1e   :  { %395 = vmatprep.subr.mxu0 %v68_v14  ;;  %437 = vmatprep.subr.mxu1 %v68_v14 }
  0x1f   :  { %396 = vmatpush3.msra.mxu0 %v68_v14  ;;  %453 = vmatpush3.msra.mxu1 %v68_v14 }
  0x20   :  { %397 = vmatprep.subr.mxu0 %v67_v15  ;;  %438 = vmatprep.subr.mxu1 %v67_v15 }
  0x21   :  { %398 = vmatpush3.msra.mxu0 %v67_v15  ;;  %454 = vmatpush3.msra.mxu1 %v67_v15 }
  0x22   :  { %399 = vmatprep.mubr.f32.mxu0 %v51_v16  ;;  %411 = vmatprep.mubr.f32.mxu1 %v59_v17 }
  0x23   :  { %400 = vmatmul.mubr.f32.vlgmr.msra.gmra.mxu0 %v52_v18  ;;  %412 = vmatmul.mubr.f32.vlgmr.msra.gmra.mxu1 %v60_v19 }
  0x24   :  { %402 = vmatprep.mubr.f32.mxu0 %v53_v20  ;;  %414 = vmatprep.mubr.f32.mxu1 %v61_v21 }
  0x27   :  { %403 = vmatmul.mubr.f32.gmra.mxu0 %v54_v22  ;;  %415 = vmatmul.mubr.f32.gmra.mxu1 %v62_v23 }
  0x28   :  { %405 = vmatprep.mubr.f32.mxu0 %v55_v24  ;;  %417 = vmatprep.mubr.f32.mxu1 %v63_v25 }
  0x2b   :  { %406 = vmatmul.mubr.f32.gmra.mxu0 %v56_v26  ;;  %418 = vmatmul.mubr.f32.gmra.mxu1 %v64_v27 }
  0x2c   :  { %408 = vmatprep.mubr.f32.mxu0 %v57_v28  ;;  %420 = vmatprep.mubr.f32.mxu1 %v65_v29 }
  0x2f   :  { %409 = vmatmul.mubr.f32.gmra.mxu0 %v58_v30  ;;  %421 = vmatmul.mubr.f32.gmra.mxu1 %v66_v31 }
  0xe3   :  { %v401_v33 = vpop.f32.mrf.mxu0  ;;  %v413_v34 = vpop.f32.mrf.mxu1 }
  0xe4   :  { %v287_v35 = vadd.f32 %v401_v33, %v334_v32  ;;  %v295_v36 = vadd.f32 %v413_v34, %v334_v32 }
  0xe5   :  { %v149_v37 = vpop.f32.mrf.mxu0  ;;  %v189_v38 = vpop.f32.mrf.mxu1 }
  0xe6   :  { %303 = vst [vmem:[#allocation3 + $0x8] sm:$0xff] %v287_v35  ;;  %311 = vst [vmem:[#allocation3 + $0x48] sm:$0xff] %v295_v36  ;;  %v286_v39 = vadd.f32 %v334_v32, %v149_v37  ;;  %v294_v40 = vadd.f32 %v334_v32, %v189_v38 }
  0xe7   :  { %v404_v41 = vpop.f32.mrf.mxu0  ;;  %v416_v42 = vpop.f32.mrf.mxu1 }
  0xe8   :  { %302 = vst [vmem:[#allocation3] sm:$0xff] %v286_v39  ;;  %310 = vst [vmem:[#allocation3 + $0x40] sm:$0xff] %v294_v40  ;;  %v289_v43 = vadd.f32 %v404_v41, %v334_v32  ;;  %v297_v44 = vadd.f32 %v416_v42, %v334_v32 }
  0xe9   :  { %v159_v45 = vpop.f32.mrf.mxu0  ;;  %v199_v46 = vpop.f32.mrf.mxu1 }
  0xea   :  { %305 = vst [vmem:[#allocation3 + $0x18] sm:$0xff] %v289_v43  ;;  %313 = vst [vmem:[#allocation3 + $0x58] sm:$0xff] %v297_v44  ;;  %v288_v47 = vadd.f32 %v334_v32, %v159_v45  ;;  %v296_v48 = vadd.f32 %v334_v32, %v199_v46 }
  0xeb   :  { %v407_v49 = vpop.f32.mrf.mxu0  ;;  %v419_v50 = vpop.f32.mrf.mxu1 }
  0xec   :  { %304 = vst [vmem:[#allocation3 + $0x10] sm:$0xff] %v288_v47  ;;  %312 = vst [vmem:[#allocation3 + $0x50] sm:$0xff] %v296_v48  ;;  %v291_v51 = vadd.f32 %v407_v49, %v334_v32  ;;  %v299_v52 = vadd.f32 %v419_v50, %v334_v32 }
  0xed   :  { %v169_v53 = vpop.f32.mrf.mxu0  ;;  %v209_v54 = vpop.f32.mrf.mxu1 }
  0xee   :  { %307 = vst [vmem:[#allocation3 + $0x28] sm:$0xff] %v291_v51  ;;  %315 = vst [vmem:[#allocation3 + $0x68] sm:$0xff] %v299_v52  ;;  %v290_v55 = vadd.f32 %v334_v32, %v169_v53  ;;  %v298_v56 = vadd.f32 %v334_v32, %v209_v54 }
  0xef   :  { %v410_v57 = vpop.f32.mrf.mxu0  ;;  %v422_v58 = vpop.f32.mrf.mxu1 }
  0xf0   :  { %306 = vst [vmem:[#allocation3 + $0x20] sm:$0xff] %v290_v55  ;;  %314 = vst [vmem:[#allocation3 + $0x60] sm:$0xff] %v298_v56  ;;  %v293_v59 = vadd.f32 %v410_v57, %v334_v32  ;;  %v301_v60 = vadd.f32 %v422_v58, %v334_v32 }
  0xf1   :  { %v179_v61 = vpop.f32.mrf.mxu0  ;;  %v219_v62 = vpop.f32.mrf.mxu1 }
  0xf2   :  { %309 = vst [vmem:[#allocation3 + $0x38] sm:$0xff] %v293_v59  ;;  %317 = vst [vmem:[#allocation3 + $0x78] sm:$0xff] %v301_v60  ;;  %v292_v63 = vadd.f32 %v334_v32, %v179_v61  ;;  %v300_v0 = vadd.f32 %v334_v32, %v219_v62 }
  0xf4   :  { %308 = vst [vmem:[#allocation3 + $0x30] sm:$0xff] %v292_v63  ;;  %316 = vst [vmem:[#allocation3 + $0x70] sm:$0xff] %v300_v0 }
  0xf5   :  { %469 = shalt.err (!%p466_p4)
}
  0xf6   :  { %s481_s1 = smov 128   ;;  %s482_s24 = smov 8  }
  0xf7   :  { %329 = dma.vmem_to_hbm [thread:$0]  %s324_s2, 2048, %s608_s3, [#allocation4], %s481_s1, %s481_s1, %s482_s24  }
  0xf8   :  { %478 = dma.done.wait [#allocation4], 2048  }
  0xf9   :  { %479 = vsyncadd [#allocation4], 4294965248 }
  0xfa   :  { %333 = vsyncpa [#allocation4], 1 }

// kernel: attention_forward.3
= control target key start
LH: loop header
LB: loop body
LE: loop exit
PB: predicated region body
PF: predicated region fallthrough
CT: control target
= control target key end

     0   :  { %7 = vsyncpa [#allocation4], 0  ;;  %s1037_s0 = inlined_call_operand.hbm [shape: f32[128,128], index: 0, kind: input, shape index: {}]   ;;  %s1038_s1 = inlined_call_operand.hbm [shape: f32[128,384], index: 1, kind: input, shape index: {}]   ;;  %s1039_s2 = inlined_call_operand.vmem [shape: f32[128,384], index: 2, kind: output, shape index: {}]  }
   0x1   :  { %8 = vsyncpa [#allocation6], 0  ;;  %s849_s9 = smov [#allocation3]  }
   0x2   :  { %s14_s10 = sshll.u32 %s849_s9, 4  ;;  %s15_s10 = int_to_ptr.vmem [resolvable:$true] %s14_s10 }
   0x3   :  { %s813_s11 = scalar_lea.vmem %s15_s10, 2048  ;;  %p818_p1 = scmp.lt.s32.totalorder %s15_s10, %s15_s10 }
   0x4   :  { %p814_p0 = scmp.ne.s32.totalorder %s15_s10, %s813_s11  ;;  %p819_p2 = scmp.lt.s32.totalorder %s813_s11, %s813_s11 }
   0x6   :  { %p820_p3 = por %p819_p2, %p818_p1 }
   0x8   :  { %p821_p4 = pnand %p820_p3, %p814_p0 }
   0xa   :  { %824 = shalt.err (!%p821_p4)
}
   0xb   :  { %s850_s12 = smov 128   ;;  %s851_s13 = smov 8  }
   0xc   :  { %20 = dma.hbm_to_vmem [thread:$0]  %s1037_s0, 2048, %s15_s10, [#allocation4], %s850_s12, %s850_s12, %s851_s13  }
   0xd   :  { %s852_s16 = smov [#allocation5]  }
   0xe   :  { %s26_s17 = sshll.u32 %s852_s16, 4  ;;  %s27_s17 = int_to_ptr.vmem [resolvable:$true] %s26_s17 }
   0xf   :  { %s833_s18 = scalar_lea.vmem %s27_s17, 6144  ;;  %p838_p6 = scmp.lt.s32.totalorder %s27_s17, %s27_s17 }
  0x10   :  { %p834_p5 = scmp.ne.s32.totalorder %s27_s17, %s833_s18  ;;  %p839_p7 = scmp.lt.s32.totalorder %s833_s18, %s833_s18 }
  0x12   :  { %p840_p8 = por %p839_p7, %p838_p6 }
  0x14   :  { %p841_p9 = pnand %p840_p8, %p834_p5 }
  0x16   :  { %844 = shalt.err (!%p841_p9)
}
  0x17   :  { %s853_s19 = smov 384   ;;  %s854_s20 = smov 24  }
  0x18   :  { %32 = dma.hbm_to_vmem [thread:$0]  %s1038_s1, 6144, %s27_s17, [#allocation6], %s853_s19, %s853_s19, %s854_s20  }
  0x19   :  { %845 = dma.done.wait [#allocation4], 2048  }
  0x1a   :  { %846 = vsyncadd [#allocation4], 4294965248 }
  0x1b   :  { %847 = dma.done.wait [#allocation6], 6144  }
  0x1c   :  { %848 = vsyncadd [#allocation6], 4294961152  ;;  %v855_v0 = vmov 0.0   ;;  %v201_v1 = vld [vmem:[#allocation5 + $0x170] sm:$0xff]  ;;  %v200_v2 = vld [vmem:[#allocation5 + $0x168] sm:$0xff] }
  0x1d   :  { %267 = vmatprep.mubr.f32.mxu0 %v855_v0  ;;  %v198_v3 = vld [vmem:[#allocation5 + $0x158] sm:$0xff]  ;;  %203 = vmatprep.subr.mxu0 %v201_v1  ;;  %v197_v4 = vld [vmem:[#allocation5 + $0x150] sm:$0xff]  ;;  %v195_v5 = vld [vmem:[#allocation5 + $0x140] sm:$0xff] }
  0x1e   :  { %204 = vmatpush1.msra.mxu0 %v200_v2  ;;  %v194_v6 = vld [vmem:[#allocation5 + $0x138] sm:$0xff]  ;;  %v192_v7 = vld [vmem:[#allocation5 + $0x128] sm:$0xff]  ;;  %v191_v8 = vld [vmem:[#allocation5 + $0x120] sm:$0xff] }
  0x1f   :  { %205 = vmatprep.subr.mxu0 %v198_v3  ;;  %v189_v9 = vld [vmem:[#allocation5 + $0x110] sm:$0xff]  ;;  %v188_v10 = vld [vmem:[#allocation5 + $0x108] sm:$0xff]  ;;  %v186_v11 = vld [vmem:[#allocation5 + $0xf8] sm:$0xff] }
  0x20   :  { %206 = vmatpush1.msra.mxu0 %v197_v4  ;;  %v185_v12 = vld [vmem:[#allocation5 + $0xf0] sm:$0xff]  ;;  %v183_v13 = vld [vmem:[#allocation5 + $0xe0] sm:$0xff]  ;;  %v202_v14 = vld [vmem:[#allocation5 + $0x178] sm:$0xff] }
  0x21   :  { %207 = vmatprep.subr.mxu0 %v195_v5  ;;  %v182_v15 = vld [vmem:[#allocation5 + $0xd8] sm:$0xff]  ;;  %742 = vmatprep.subr.mxu1 %v202_v14  ;;  %v199_v16 = vld [vmem:[#allocation5 + $0x160] sm:$0xff]  ;;  %v180_v17 = vld [vmem:[#allocation5 + $0xc8] sm:$0xff] }
  0x22   :  { %208 = vmatpush1.msra.mxu0 %v194_v6  ;;  %743 = vmatpush3.msra.mxu1 %v202_v14  ;;  %v196_v18 = vld [vmem:[#allocation5 + $0x148] sm:$0xff]  ;;  %v179_v19 = vld [vmem:[#allocation5 + $0xc0] sm:$0xff]  ;;  %v177_v20 = vld [vmem:[#allocation5 + $0xb0] sm:$0xff] }
  0x23   :  { %209 = vmatprep.subr.mxu0 %v192_v7  ;;  %744 = vmatprep.subr.mxu1 %v199_v16  ;;  %v193_v21 = vld [vmem:[#allocation5 + $0x130] sm:$0xff]  ;;  %v176_v22 = vld [vmem:[#allocation5 + $0xa8] sm:$0xff]  ;;  %v174_v23 = vld [vmem:[#allocation5 + $0x98] sm:$0xff] }
  0x24   :  { %210 = vmatpush1.msra.mxu0 %v191_v8  ;;  %745 = vmatpush3.msra.mxu1 %v199_v16  ;;  %v190_v24 = vld [vmem:[#allocation5 + $0x118] sm:$0xff]  ;;  %v173_v25 = vld [vmem:[#allocation5 + $0x90] sm:$0xff]  ;;  %v171_v26 = vld [vmem:[#allocation5 + $0x80] sm:$0xff] }
  0x25   :  { %211 = vmatprep.subr.mxu0 %v189_v9  ;;  %746 = vmatprep.subr.mxu1 %v196_v18  ;;  %v187_v27 = vld [vmem:[#allocation5 + $0x100] sm:$0xff]  ;;  %v170_v28 = vld [vmem:[#allocation5 + $0x78] sm:$0xff]  ;;  %v168_v29 = vld [vmem:[#allocation5 + $0x68] sm:$0xff] }
  0x26   :  { %212 = vmatpush1.msra.mxu0 %v188_v10  ;;  %747 = vmatpush3.msra.mxu1 %v196_v18  ;;  %v184_v30 = vld [vmem:[#allocation5 + $0xe8] sm:$0xff]  ;;  %v167_v31 = vld [vmem:[#allocation5 + $0x60] sm:$0xff]  ;;  %v165_v32 = vld [vmem:[#allocation5 + $0x50] sm:$0xff] }
  0x27   :  { %213 = vmatprep.subr.mxu0 %v186_v11  ;;  %748 = vmatprep.subr.mxu1 %v193_v21  ;;  %v181_v33 = vld [vmem:[#allocation5 + $0xd0] sm:$0xff]  ;;  %v164_v34 = vld [vmem:[#allocation5 + $0x48] sm:$0xff]  ;;  %v162_v35 = vld [vmem:[#allocation5 + $0x38] sm:$0xff] }
  0x28   :  { %214 = vmatpush1.msra.mxu0 %v185_v12  ;;  %749 = vmatpush3.msra.mxu1 %v193_v21  ;;  %v178_v36 = vld [vmem:[#allocation5 + $0xb8] sm:$0xff]  ;;  %v161_v37 = vld [vmem:[#allocation5 + $0x30] sm:$0xff]  ;;  %v159_v38 = vld [vmem:[#allocation5 + $0x20] sm:$0xff] }
  0x29   :  { %215 = vmatprep.subr.mxu0 %v183_v13  ;;  %750 = vmatprep.subr.mxu1 %v190_v24  ;;  %v175_v39 = vld [vmem:[#allocation5 + $0xa0] sm:$0xff]  ;;  %v158_v40 = vld [vmem:[#allocation5 + $0x18] sm:$0xff]  ;;  %v156_v41 = vld [vmem:[#allocation5 + $0x8] sm:$0xff] }
  0x2a   :  { %216 = vmatpush1.msra.mxu0 %v182_v15  ;;  %751 = vmatpush3.msra.mxu1 %v190_v24  ;;  %v172_v42 = vld [vmem:[#allocation5 + $0x88] sm:$0xff]  ;;  %v155_v43 = vld [vmem:[#allocation5] sm:$0xff]  ;;  %v169_v45 = vld [vmem:[#allocation5 + $0x70] sm:$0xff] }
  0x2b   :  { %217 = vmatprep.subr.mxu0 %v180_v17  ;;  %752 = vmatprep.subr.mxu1 %v187_v27  ;;  %v139_v44 = vld [vmem:[#allocation3] sm:$0xff]  ;;  %v166_v46 = vld [vmem:[#allocation5 + $0x58] sm:$0xff]  ;;  %v140_v47 = vld [vmem:[#allocation3 + $0x8] sm:$0xff] }
  0x2c   :  { %218 = vmatpush1.msra.mxu0 %v179_v19  ;;  %753 = vmatpush3.msra.mxu1 %v187_v27  ;;  %v163_v48 = vld [vmem:[#allocation5 + $0x40] sm:$0xff]  ;;  %v160_v49 = vld [vmem:[#allocation5 + $0x28] sm:$0xff]  ;;  %v141_v50 = vld [vmem:[#allocation3 + $0x10] sm:$0xff] }
  0x2d   :  { %219 = vmatprep.subr.mxu0 %v177_v20  ;;  %754 = vmatprep.subr.mxu1 %v184_v30  ;;  %v157_v51 = vld [vmem:[#allocation5 + $0x10] sm:$0xff]  ;;  %v142_v52 = vld [vmem:[#allocation3 + $0x18] sm:$0xff]  ;;  %v143_v53 = vld [vmem:[#allocation3 + $0x20] sm:$0xff] }
  0x2e   :  { %220 = vmatpush1.msra.mxu0 %v176_v22  ;;  %755 = vmatpush3.msra.mxu1 %v184_v30  ;;  %v144_v54 = vld [vmem:[#allocation3 + $0x28] sm:$0xff]  ;;  %v145_v55 = vld [vmem:[#allocation3 + $0x30] sm:$0xff]  ;;  %v146_v56 = vld [vmem:[#allocation3 + $0x38] sm:$0xff] }
  0x2f   :  { %221 = vmatprep.subr.mxu0 %v174_v23  ;;  %756 = vmatprep.subr.mxu1 %v181_v33  ;;  %v147_v57 = vld [vmem:[#allocation3 + $0x40] sm:$0xff]  ;;  %v148_v58 = vld [vmem:[#allocation3 + $0x48] sm:$0xff]  ;;  %v149_v59 = vld [vmem:[#allocation3 + $0x50] sm:$0xff] }
  0x30   :  { %222 = vmatpush1.msra.mxu0 %v173_v25  ;;  %757 = vmatpush3.msra.mxu1 %v181_v33  ;;  %v150_v60 = vld [vmem:[#allocation3 + $0x58] sm:$0xff]  ;;  %v151_v61 = vld [vmem:[#allocation3 + $0x60] sm:$0xff]  ;;  %v153_v62 = vld [vmem:[#allocation3 + $0x70] sm:$0xff] }
  0x31   :  { %223 = vmatprep.subr.mxu0 %v171_v26  ;;  %758 = vmatprep.subr.mxu1 %v178_v36  ;;  %v152_v63 = vld [vmem:[#allocation3 + $0x68] sm:$0xff]  ;;  %v154_v1 = vld [vmem:[#allocation3 + $0x78] sm:$0xff] }
  0x32   :  { %224 = vmatpush1.msra.mxu0 %v170_v28  ;;  %759 = vmatpush3.msra.mxu1 %v178_v36 }
  0x33   :  { %225 = vmatprep.subr.mxu0 %v168_v29  ;;  %760 = vmatprep.subr.mxu1 %v175_v39 }
  0x34   :  { %226 = vmatpush1.msra.mxu0 %v167_v31  ;;  %761 = vmatpush3.msra.mxu1 %v175_v39 }
  0x35   :  { %227 = vmatprep.subr.mxu0 %v165_v32  ;;  %762 = vmatprep.subr.mxu1 %v172_v42 }
  0x36   :  { %228 = vmatpush1.msra.mxu0 %v164_v34  ;;  %763 = vmatpush3.msra.mxu1 %v172_v42 }
  0x37   :  { %229 = vmatprep.subr.mxu0 %v162_v35  ;;  %764 = vmatprep.subr.mxu1 %v169_v45 }
  0x38   :  { %230 = vmatpush1.msra.mxu0 %v161_v37  ;;  %765 = vmatpush3.msra.mxu1 %v169_v45 }
  0x39   :  { %231 = vmatprep.subr.mxu0 %v159_v38  ;;  %766 = vmatprep.subr.mxu1 %v166_v46 }
  0x3a   :  { %232 = vmatpush1.msra.mxu0 %v158_v40  ;;  %774 = vmatprep.mubr.f32.mxu1 %v139_v44 }
  0x3b   :  { %233 = vmatprep.subr.mxu0 %v156_v41  ;;  %767 = vmatpush3.msra.mxu1 %v166_v46 }
  0x3c   :  { %234 = vmatpush1.msra.mxu0 %v155_v43  ;;  %768 = vmatprep.subr.mxu1 %v163_v48 }
  0x3d   :  { %268 = vmatmul.mubr.f32.vlgmr.msra.gmra.mxu0 %v139_v44  ;;  %769 = vmatpush3.msra.mxu1 %v163_v48 }
  0x3e   :  { %273 = vmatprep.mubr.f32.mxu0 %v855_v0  ;;  %770 = vmatprep.subr.mxu1 %v160_v49 }
  0x3f   :  { %771 = vmatpush3.msra.mxu1 %v160_v49 }
  0x40   :  { %772 = vmatprep.subr.mxu1 %v157_v51 }
  0x41   :  { %274 = vmatmul.mubr.f32.gmra.mxu0 %v140_v47  ;;  %773 = vmatpush3.msra.mxu1 %v157_v51 }
  0x42   :  { %279 = vmatprep.mubr.f32.mxu0 %v855_v0  ;;  %775 = vmatmul.mubr.f32.vlgmr.msra.gmra.mxu1 %v140_v47 }
  0x43   :  { %777 = vmatprep.mubr.f32.mxu1 %v141_v50 }
  0x45   :  { %280 = vmatmul.mubr.f32.gmra.mxu0 %v141_v50 }
  0x46   :  { %285 = vmatprep.mubr.f32.mxu0 %v855_v0  ;;  %778 = vmatmul.mubr.f32.gmra.mxu1 %v142_v52 }
  0x47   :  { %780 = vmatprep.mubr.f32.mxu1 %v143_v53 }
  0x49   :  { %286 = vmatmul.mubr.f32.gmra.mxu0 %v142_v52 }
  0x4a   :  { %291 = vmatprep.mubr.f32.mxu0 %v855_v0  ;;  %781 = vmatmul.mubr.f32.gmra.mxu1 %v144_v54 }
  0x4b   :  { %783 = vmatprep.mubr.f32.mxu1 %v145_v55 }
  0x4d   :  { %292 = vmatmul.mubr.f32.gmra.mxu0 %v143_v53 }
  0x4e   :  { %297 = vmatprep.mubr.f32.mxu0 %v855_v0  ;;  %784 = vmatmul.mubr.f32.gmra.mxu1 %v146_v56 }
  0x4f   :  { %786 = vmatprep.mubr.f32.mxu1 %v147_v57 }
  0x51   :  { %298 = vmatmul.mubr.f32.gmra.mxu0 %v144_v54 }
  0x52   :  { %303 = vmatprep.mubr.f32.mxu0 %v855_v0  ;;  %787 = vmatmul.mubr.f32.gmra.mxu1 %v148_v58 }
  0x53   :  { %789 = vmatprep.mubr.f32.mxu1 %v149_v59 }
  0x55   :  { %304 = vmatmul.mubr.f32.gmra.mxu0 %v145_v55 }
  0x56   :  { %309 = vmatprep.mubr.f32.mxu0 %v855_v0  ;;  %790 = vmatmul.mubr.f32.gmra.mxu1 %v150_v60 }
  0x57   :  { %792 = vmatprep.mubr.f32.mxu1 %v151_v61 }
  0x59   :  { %310 = vmatmul.mubr.f32.gmra.mxu0 %v146_v56 }
  0x5a   :  { %315 = vmatprep.mubr.f32.mxu0 %v855_v0  ;;  %793 = vmatmul.mubr.f32.gmra.mxu1 %v152_v63 }
  0x5b   :  { %795 = vmatprep.mubr.f32.mxu1 %v153_v62 }
  0x5d   :  { %316 = vmatmul.mubr.f32.gmra.mxu0 %v147_v57 }
  0x5e   :  { %321 = vmatprep.mubr.f32.mxu0 %v855_v0  ;;  %796 = vmatmul.mubr.f32.gmra.mxu1 %v154_v1 }
  0x61   :  { %322 = vmatmul.mubr.f32.gmra.mxu0 %v148_v58 }
  0x62   :  { %327 = vmatprep.mubr.f32.mxu0 %v855_v0 }
  0x65   :  { %328 = vmatmul.mubr.f32.gmra.mxu0 %v149_v59 }
  0x66   :  { %333 = vmatprep.mubr.f32.mxu0 %v855_v0 }
  0x69   :  { %334 = vmatmul.mubr.f32.gmra.mxu0 %v150_v60 }
  0x6a   :  { %339 = vmatprep.mubr.f32.mxu0 %v855_v0 }
  0x6d   :  { %340 = vmatmul.mubr.f32.gmra.mxu0 %v151_v61 }
  0x6e   :  { %345 = vmatprep.mubr.f32.mxu0 %v855_v0 }
  0x71   :  { %346 = vmatmul.mubr.f32.gmra.mxu0 %v152_v63 }
  0x72   :  { %351 = vmatprep.mubr.f32.mxu0 %v855_v0 }
  0x75   :  { %352 = vmatmul.mubr.f32.gmra.mxu0 %v153_v62 }
  0x76   :  { %357 = vmatprep.mubr.f32.mxu0 %v855_v0 }
  0x79   :  { %358 = vmatmul.mubr.f32.gmra.mxu0 %v154_v1 }
  0xfd   :  { %v269_v2 = vpop.f32.mrf.mxu0 }
  0xfe   :  { %656 = vst [vmem:[%s1039_s2] sm:$0xff] %v269_v2 }
  0xff   :  { %v271_v3 = vpop.f32.mrf.mxu0 }
 0x100   :  { %657 = vst [vmem:[%s1039_s2 + $0x8] sm:$0xff] %v271_v3 }
 0x101   :  { %v275_v4 = vpop.f32.mrf.mxu0 }
 0x102   :  { %659 = vst [vmem:[%s1039_s2 + $0x18] sm:$0xff] %v275_v4  ;;  %v776_v7 = vpop.f32.mrf.mxu1 }
 0x103   :  { %v277_v5 = vpop.f32.mrf.mxu0  ;;  %661 = vst [vmem:[%s1039_s2 + $0x28] sm:$0xff] %v776_v7 }
 0x104   :  { %660 = vst [vmem:[%s1039_s2 + $0x20] sm:$0xff] %v277_v5  ;;  %v430_v9 = vpop.f32.mrf.mxu1 }
 0x105   :  { %v281_v0 = vpop.f32.mrf.mxu0  ;;  %658 = vst [vmem:[%s1039_s2 + $0x10] sm:$0xff] %v430_v9 }
 0x106   :  { %662 = vst [vmem:[%s1039_s2 + $0x30] sm:$0xff] %v281_v0  ;;  %v779_v11 = vpop.f32.mrf.mxu1 }
 0x107   :  { %v283_v6 = vpop.f32.mrf.mxu0  ;;  %667 = vst [vmem:[%s1039_s2 + $0x58] sm:$0xff] %v779_v11 }
 0x108   :  { %663 = vst [vmem:[%s1039_s2 + $0x38] sm:$0xff] %v283_v6  ;;  %v440_v13 = vpop.f32.mrf.mxu1 }
 0x109   :  { %v287_v8 = vpop.f32.mrf.mxu0  ;;  %664 = vst [vmem:[%s1039_s2 + $0x40] sm:$0xff] %v440_v13 }
 0x10a   :  { %665 = vst [vmem:[%s1039_s2 + $0x48] sm:$0xff] %v287_v8  ;;  %v782_v15 = vpop.f32.mrf.mxu1 }
 0x10b   :  { %v289_v10 = vpop.f32.mrf.mxu0  ;;  %673 = vst [vmem:[%s1039_s2 + $0x88] sm:$0xff] %v782_v15 }
 0x10c   :  { %666 = vst [vmem:[%s1039_s2 + $0x50] sm:$0xff] %v289_v10  ;;  %v450_v17 = vpop.f32.mrf.mxu1 }
 0x10d   :  { %v293_v12 = vpop.f32.mrf.mxu0  ;;  %670 = vst [vmem:[%s1039_s2 + $0x70] sm:$0xff] %v450_v17 }
 0x10e   :  { %668 = vst [vmem:[%s1039_s2 + $0x60] sm:$0xff] %v293_v12  ;;  %v785_v19 = vpop.f32.mrf.mxu1 }
 0x10f   :  { %v295_v14 = vpop.f32.mrf.mxu0  ;;  %679 = vst [vmem:[%s1039_s2 + $0xb8] sm:$0xff] %v785_v19 }
 0x110   :  { %669 = vst [vmem:[%s1039_s2 + $0x68] sm:$0xff] %v295_v14  ;;  %v460_v21 = vpop.f32.mrf.mxu1 }
 0x111   :  { %v299_v16 = vpop.f32.mrf.mxu0  ;;  %676 = vst [vmem:[%s1039_s2 + $0xa0] sm:$0xff] %v460_v21 }
 0x112   :  { %671 = vst [vmem:[%s1039_s2 + $0x78] sm:$0xff] %v299_v16  ;;  %v788_v23 = vpop.f32.mrf.mxu1 }
 0x113   :  { %v301_v18 = vpop.f32.mrf.mxu0  ;;  %685 = vst [vmem:[%s1039_s2 + $0xe8] sm:$0xff] %v788_v23 }
 0x114   :  { %672 = vst [vmem:[%s1039_s2 + $0x80] sm:$0xff] %v301_v18  ;;  %v470_v25 = vpop.f32.mrf.mxu1 }
 0x115   :  { %v305_v20 = vpop.f32.mrf.mxu0  ;;  %682 = vst [vmem:[%s1039_s2 + $0xd0] sm:$0xff] %v470_v25 }
 0x116   :  { %674 = vst [vmem:[%s1039_s2 + $0x90] sm:$0xff] %v305_v20  ;;  %v791_v27 = vpop.f32.mrf.mxu1 }
 0x117   :  { %v307_v22 = vpop.f32.mrf.mxu0  ;;  %691 = vst [vmem:[%s1039_s2 + $0x118] sm:$0xff] %v791_v27 }
 0x118   :  { %675 = vst [vmem:[%s1039_s2 + $0x98] sm:$0xff] %v307_v22  ;;  %v480_v29 = vpop.f32.mrf.mxu1 }
 0x119   :  { %v311_v24 = vpop.f32.mrf.mxu0  ;;  %688 = vst [vmem:[%s1039_s2 + $0x100] sm:$0xff] %v480_v29 }
 0x11a   :  { %677 = vst [vmem:[%s1039_s2 + $0xa8] sm:$0xff] %v311_v24  ;;  %v794_v31 = vpop.f32.mrf.mxu1 }
 0x11b   :  { %v313_v26 = vpop.f32.mrf.mxu0  ;;  %697 = vst [vmem:[%s1039_s2 + $0x148] sm:$0xff] %v794_v31 }
 0x11c   :  { %678 = vst [vmem:[%s1039_s2 + $0xb0] sm:$0xff] %v313_v26  ;;  %v490_v33 = vpop.f32.mrf.mxu1 }
 0x11d   :  { %v317_v28 = vpop.f32.mrf.mxu0  ;;  %694 = vst [vmem:[%s1039_s2 + $0x130] sm:$0xff] %v490_v33 }
 0x11e   :  { %680 = vst [vmem:[%s1039_s2 + $0xc0] sm:$0xff] %v317_v28  ;;  %v797_v35 = vpop.f32.mrf.mxu1 }
 0x11f   :  { %v319_v30 = vpop.f32.mrf.mxu0  ;;  %703 = vst [vmem:[%s1039_s2 + $0x178] sm:$0xff] %v797_v35 }
 0x120   :  { %681 = vst [vmem:[%s1039_s2 + $0xc8] sm:$0xff] %v319_v30  ;;  %v500_v37 = vpop.f32.mrf.mxu1 }
 0x121   :  { %v323_v32 = vpop.f32.mrf.mxu0  ;;  %700 = vst [vmem:[%s1039_s2 + $0x160] sm:$0xff] %v500_v37 }
 0x122   :  { %683 = vst [vmem:[%s1039_s2 + $0xd8] sm:$0xff] %v323_v32 }
 0x123   :  { %v325_v34 = vpop.f32.mrf.mxu0 }
 0x124   :  { %684 = vst [vmem:[%s1039_s2 + $0xe0] sm:$0xff] %v325_v34 }
 0x125   :  { %v329_v36 = vpop.f32.mrf.mxu0 }
 0x126   :  { %686 = vst [vmem:[%s1039_s2 + $0xf0] sm:$0xff] %v329_v36 }
 0x127   :  { %v331_v38 = vpop.f32.mrf.mxu0 }
 0x128   :  { %687 = vst [vmem:[%s1039_s2 + $0xf8] sm:$0xff] %v331_v38 }
 0x129   :  { %v335_v39 = vpop.f32.mrf.mxu0 }
 0x12a   :  { %689 = vst [vmem:[%s1039_s2 + $0x108] sm:$0xff] %v335_v39 }
 0x12b   :  { %v337_v40 = vpop.f32.mrf.mxu0 }
 0x12c   :  { %690 = vst [vmem:[%s1039_s2 + $0x110] sm:$0xff] %v337_v40 }
 0x12d   :  { %v341_v41 = vpop.f32.mrf.mxu0 }
 0x12e   :  { %692 = vst [vmem:[%s1039_s2 + $0x120] sm:$0xff] %v341_v41 }
 0x12f   :  { %v343_v42 = vpop.f32.mrf.mxu0 }
 0x130   :  { %693 = vst [vmem:[%s1039_s2 + $0x128] sm:$0xff] %v343_v42 }
 0x131   :  { %v347_v43 = vpop.f32.mrf.mxu0 }
 0x132   :  { %695 = vst [vmem:[%s1039_s2 + $0x138] sm:$0xff] %v347_v43 }
 0x133   :  { %v349_v44 = vpop.f32.mrf.mxu0 }
 0x134   :  { %696 = vst [vmem:[%s1039_s2 + $0x140] sm:$0xff] %v349_v44 }
 0x135   :  { %v353_v45 = vpop.f32.mrf.mxu0 }
 0x136   :  { %698 = vst [vmem:[%s1039_s2 + $0x150] sm:$0xff] %v353_v45 }
 0x137   :  { %v355_v46 = vpop.f32.mrf.mxu0 }
 0x138   :  { %699 = vst [vmem:[%s1039_s2 + $0x158] sm:$0xff] %v355_v46 }
 0x139   :  { %v359_v47 = vpop.f32.mrf.mxu0 }
 0x13a   :  { %701 = vst [vmem:[%s1039_s2 + $0x168] sm:$0xff] %v359_v47 }
 0x13b   :  { %v361_v48 = vpop.f32.mrf.mxu0 }
 0x13c   :  { %702 = vst [vmem:[%s1039_s2 + $0x170] sm:$0xff] %v361_v48 }
 0x13d   :  { %708 = vsyncpa [#allocation4], 1 }
 0x13e   :  { %709 = vsyncpa [#allocation6], 1 }

// kernel: attention_forward.4
= control target key start
LH: loop header
LB: loop body
LE: loop exit
PB: predicated region body
PF: predicated region fallthrough
CT: control target
= control target key end

     0   :  { %s2205_s12 = smov 0   ;;  %s2207_s13 = smov 0   ;;  %s2898_s0 = inlined_call_operand.vmem [shape: f32[2,64,384], index: 0, kind: input, shape index: {}, may-alias: {0,1,2}]   ;;  %s2899_s1 = inlined_call_operand.vmem [shape: f32[2,64,384], index: 1, kind: input, shape index: {}, may-alias: {0,1,2}]   ;;  %s2900_s2 = inlined_call_operand.vmem [shape: f32[2,64,384], index: 2, kind: input, shape index: {}, may-alias: {0,1,2}]   ;;  %s2901_s3 = inlined_call_operand.vmem [shape: f32[2,64,128], index: 3, kind: output, shape index: {}]  }
   0x1   :  { %s2209_s14 = smov 0   ;;  %s2211_s15 = smov 0  }
   0x2   :  { %s2213_s16 = smov 0  }
   0x3 LB: > { %s39_s17 = sadd.s32 1, %s2175_s15  ;;  %p57_p1 = scmp.ne.s32.totalorder %s2167_s13, %s2163_s12  ;;  %s2179_s16 = sphi %s2213_s16, %s13_s16   ;;  %s2175_s15 = sphi %s2211_s15, %s2928_s15   ;;  %s2171_s14 = sphi %s2209_s14, %s2927_s14   ;;  %s2167_s13 = sphi %s2207_s13, %s2926_s13   ;;  %s2163_s12 = sphi %s2205_s12, %s2925_s12  }
   0x4   : > { %p41_p0 = scmp.ge.s32.totalorder %s39_s17, 2  ;;  %p58_p2 = scmp.eq.s32.totalorder %s2179_s16, 0 }
   0x5   : > { %s50_s20 = sadd.s32 1, %s2167_s13  ;;  %p1846_p5 = scmp.ge.s32.totalorder %s2179_s16, 2 }
   0x6   : > { %s2930_s17 = smov (%p41_p0, %s39_s17), 0  ;;  %p2236_p3 = por %p58_p2, %p57_p1 }
   0x7   : > { %s43_s19 = ssub.s32 %s2175_s15, %s2930_s17  ;;  %177 = sbr.rel (%p1846_p5) target bundleno = 39 (0x27), region = 16 }
   0x8   : > { %p48_p4 = scmp.eq.s32.totalorder %s43_s19, 0 }
   0xa   : > { %s2244_s21 = scalar_select %p48_p4, %s2167_s13, %s50_s20  }
   0xc   : > { %180 = sbr.rel (!%p2236_p3) target bundleno = 21 (0x15), region = 20  ;;  %s182_s22 = sand.u32 (%p2236_p3), 1, %s2167_s13  }
   0xd   : > { %s1998_s23 = smul.u32 (%p2236_p3), 192, %s2175_s15  ;;  %s1847_s24 = sshll.u32 (%p2236_p3), %s182_s22, 6 }
   0xe   : > { %s184_s28 = scalar_lea.vmem (%p2236_p3), [#allocation5], %s1847_s24 }
   0xf   : > { %s191_s27 = scalar_lea.vmem (%p2236_p3), %s2898_s0, %s1998_s23 }
  0x10   : > { %v234_v0 = vld [vmem:[%s191_s27] sm:$0xff] (%p2236_p3)  ;;  %v236_v1 = vld [vmem:[%s191_s27 + $0x18] sm:$0xff] (%p2236_p3)  ;;  %v238_v2 = vld [vmem:[%s191_s27 + $0x30] sm:$0xff] (%p2236_p3) }
  0x11   : > { %235 = vst [vmem:[%s184_s28] sm:$0xff] %v234_v0  ;;  %237 = vst [vmem:[%s184_s28 + $0x8] sm:$0xff] %v236_v1  ;;  %v240_v3 = vld [vmem:[%s191_s27 + $0x48] sm:$0xff]  ;;  %v242_v4 = vld [vmem:[%s191_s27 + $0x60] sm:$0xff] }
  0x12   : > { %239 = vst [vmem:[%s184_s28 + $0x10] sm:$0xff] %v238_v2  ;;  %v244_v5 = vld [vmem:[%s191_s27 + $0x78] sm:$0xff]  ;;  %241 = vst [vmem:[%s184_s28 + $0x18] sm:$0xff] %v240_v3  ;;  %v246_v6 = vld [vmem:[%s191_s27 + $0x90] sm:$0xff] }
  0x13   : > { %243 = vst [vmem:[%s184_s28 + $0x20] sm:$0xff] %v242_v4  ;;  %245 = vst [vmem:[%s184_s28 + $0x28] sm:$0xff] %v244_v5  ;;  %v248_v7 = vld [vmem:[%s191_s27 + $0xa8] sm:$0xff] }
  0x14   : > { %247 = vst [vmem:[%s184_s28 + $0x30] sm:$0xff] %v246_v6  ;;  %249 = vst [vmem:[%s184_s28 + $0x38] sm:$0xff] %v248_v7 }
  0x15 PF: > { %255 = sbr.rel (!%p2236_p3) target bundleno = 30 (0x1e), region = 58  ;;  %s257_s29 = sand.u32 (%p2236_p3), 1, %s2167_s13  }
  0x16   : > { %s1850_s30 = smul.u32 (%p2236_p3), 192, %s2175_s15  ;;  %s1849_s4 = sshll.u32 (%p2236_p3), %s257_s29, 6 }
  0x17   : > { %s259_s8 = scalar_lea.vmem (%p2236_p3), [#allocation6], %s1849_s4 }
  0x18   : > { %s1741_s7 = scalar_lea.vmem (%p2236_p3), %s2899_s1, %s1850_s30 }
  0x19   : > { %v1851_v8 = vld [vmem:[%s1741_s7 + $0x8] sm:$0xff] (%p2236_p3)  ;;  %v1852_v9 = vld [vmem:[%s1741_s7 + $0x20] sm:$0xff] (%p2236_p3)  ;;  %v1853_v10 = vld [vmem:[%s1741_s7 + $0x38] sm:$0xff] (%p2236_p3) }
  0x1a   : > { %311 = vst [vmem:[%s259_s8] sm:$0xff] %v1851_v8  ;;  %313 = vst [vmem:[%s259_s8 + $0x8] sm:$0xff] %v1852_v9  ;;  %v1854_v11 = vld [vmem:[%s1741_s7 + $0x50] sm:$0xff]  ;;  %v1855_v12 = vld [vmem:[%s1741_s7 + $0x68] sm:$0xff] }
  0x1b   : > { %315 = vst [vmem:[%s259_s8 + $0x10] sm:$0xff] %v1853_v10  ;;  %v1856_v13 = vld [vmem:[%s1741_s7 + $0x80] sm:$0xff]  ;;  %317 = vst [vmem:[%s259_s8 + $0x18] sm:$0xff] %v1854_v11  ;;  %v1857_v14 = vld [vmem:[%s1741_s7 + $0x98] sm:$0xff] }
  0x1c   : > { %319 = vst [vmem:[%s259_s8 + $0x20] sm:$0xff] %v1855_v12  ;;  %321 = vst [vmem:[%s259_s8 + $0x28] sm:$0xff] %v1856_v13  ;;  %v1858_v15 = vld [vmem:[%s1741_s7 + $0xb0] sm:$0xff] }
  0x1d   : > { %323 = vst [vmem:[%s259_s8 + $0x30] sm:$0xff] %v1857_v14  ;;  %325 = vst [vmem:[%s259_s8 + $0x38] sm:$0xff] %v1858_v15 }
  0x1e PF: > { %331 = sbr.rel (!%p2236_p3) target bundleno = 39 (0x27), region = 96  ;;  %s333_s9 = sand.u32 (%p2236_p3), 1, %s2167_s13  }
  0x1f   : > { %s1860_s10 = smul.u32 (%p2236_p3), 192, %s2175_s15  ;;  %s1859_s11 = sshll.u32 (%p2236_p3), %s333_s9, 6 }
  0x20   : > { %s335_s23 = scalar_lea.vmem (%p2236_p3), [#allocation7], %s1859_s11 }
  0x21   : > { %s1750_s22 = scalar_lea.vmem (%p2236_p3), %s2900_s2, %s1860_s10 }
  0x22   : > { %v1861_v16 = vld [vmem:[%s1750_s22 + $0x10] sm:$0xff] (%p2236_p3)  ;;  %v1862_v17 = vld [vmem:[%s1750_s22 + $0x28] sm:$0xff] (%p2236_p3)  ;;  %v1863_v18 = vld [vmem:[%s1750_s22 + $0x40] sm:$0xff] (%p2236_p3) }
  0x23   : > { %387 = vst [vmem:[%s335_s23] sm:$0xff] %v1861_v16  ;;  %389 = vst [vmem:[%s335_s23 + $0x8] sm:$0xff] %v1862_v17  ;;  %v1864_v19 = vld [vmem:[%s1750_s22 + $0x58] sm:$0xff]  ;;  %v1865_v20 = vld [vmem:[%s1750_s22 + $0x70] sm:$0xff] }
  0x24   : > { %391 = vst [vmem:[%s335_s23 + $0x10] sm:$0xff] %v1863_v18  ;;  %v1866_v21 = vld [vmem:[%s1750_s22 + $0x88] sm:$0xff]  ;;  %393 = vst [vmem:[%s335_s23 + $0x18] sm:$0xff] %v1864_v19  ;;  %v1867_v22 = vld [vmem:[%s1750_s22 + $0xa0] sm:$0xff] }
  0x25   : > { %395 = vst [vmem:[%s335_s23 + $0x20] sm:$0xff] %v1865_v20  ;;  %397 = vst [vmem:[%s335_s23 + $0x28] sm:$0xff] %v1866_v21  ;;  %v1868_v23 = vld [vmem:[%s1750_s22 + $0xb8] sm:$0xff] }
  0x26   : > { %399 = vst [vmem:[%s335_s23 + $0x30] sm:$0xff] %v1867_v22  ;;  %401 = vst [vmem:[%s335_s23 + $0x38] sm:$0xff] %v1868_v23 }
  0x27 PF: > { %p1869_p6 = scmp.ge.s32.totalorder %s2179_s16, 1  ;;  %p406_p7 = scmp.lt.s32.totalorder %s2179_s16, 3 }
  0x29   : > { %p407_p8 = pnand %p1869_p6, %p406_p7 }
  0x2b   : > { %410 = sbr.rel (%p407_p8) target bundleno = 1515 (0x5eb), region = 134 }
  0x30   : > { %s413_s18 = sand.u32 1, %s2163_s12   ;;  %vm521_vm0 = vcmask 523264   ;;  %vm488_vm1 = vcmask 7168   ;;  %v2181_v60 = vmov -inf   ;;  %v2182_v9 = vmov 0   ;;  %s2184_s12 = smov 64  }
  0x31   : > { %s2271_s24 = sshll.u32 %s413_s18, 6  ;;  %491 = vst.msk [vmem:[#allocation2 + $0x10] sm:$0xff] %vm488_vm1, %v2181_v60  ;;  %489 = vst.msk [vmem:[#allocation2] sm:$0xff] %vm488_vm1, %v2181_v60  ;;  %2044 = vset.pattern.permute.xlu1 %v2182_v9  ;;  %2043 = vset.pattern.permute.xlu0 %v2182_v9  ;;  %v2183_v14 = vmov 0.0   ;;  %p471_p9 = scmp.lt.s32.totalorder %s2171_s14, 1 }
  0x32   : > { %s422_s25 = scalar_lea.vmem [#allocation6], %s2271_s24  ;;  %s2279_s26 = scalar_lea.vmem [#allocation5], %s2271_s24  ;;  %490 = vst.msk [vmem:[#allocation2 + $0x8] sm:$0xff] %vm488_vm1, %v2181_v60  ;;  %492 = vst.msk [vmem:[#allocation2 + $0x18] sm:$0xff] %vm488_vm1, %v2181_v60 }
  0x33   : > { %v552_v24 = vld [vmem:[%s422_s25 + $0x30] sm:$0xff]  ;;  %v553_v25 = vld [vmem:[%s422_s25 + $0x38] sm:$0xff]  ;;  %v550_v26 = vld [vmem:[%s422_s25 + $0x20] sm:$0xff]  ;;  %493 = vst.msk [vmem:[#allocation2 + $0x20] sm:$0xff] %vm488_vm1, %v2181_v60  ;;  %s2452_s27 = scalar_lea.vmem [#allocation7], %s2271_s24  ;;  %s2932_s14 = smov (!%p471_p9, %s2171_s14), 1 }
  0x34   : > { %v2274_v27 = vpack.c.bf16 %v553_v25, %v552_v24  ;;  %v551_v28 = vld [vmem:[%s422_s25 + $0x28] sm:$0xff]  ;;  %v538_v30 = vld [vmem:[%s2279_s26] sm:$0xff]  ;;  %v548_v35 = vld [vmem:[%s422_s25 + $0x10] sm:$0xff]  ;;  %494 = vst.msk [vmem:[#allocation2 + $0x28] sm:$0xff] %vm488_vm1, %v2181_v60  ;;  %s1893_s28 = sshll.u32 %s2932_s14, 6 }
  0x35   : > { %v2276_v29 = vpack.c.bf16 %v551_v28, %v550_v26  ;;  %v539_v32 = vld [vmem:[%s2279_s26 + $0x8] sm:$0xff]  ;;  %v562_v33 = vmul.f32 0.125, %v538_v30  ;;  %v549_v36 = vld [vmem:[%s422_s25 + $0x18] sm:$0xff]  ;;  %v546_v40 = vld [vmem:[%s422_s25] sm:$0xff]  ;;  %495 = vst.msk [vmem:[#allocation2 + $0x30] sm:$0xff] %vm488_vm1, %v2181_v60  ;;  %s2865_s4 = scalar_lea.vmem %s2901_s3, %s1893_s28 }
  0x36   : > { %1990 = vmatprep.subr.msk.bf16.mxu0 %vm521_vm0, %v2274_v27  ;;  %v605_v31 = vsel %vm521_vm0, %v2274_v27, 0  ;;  %v563_v34 = vmul.f32 0.125, %v539_v32  ;;  %v2295_v39 = vpack.c.bf16 %v549_v36, %v548_v35  ;;  %v547_v41 = vld [vmem:[%s422_s25 + $0x8] sm:$0xff]  ;;  %v540_v44 = vld [vmem:[%s2279_s26 + $0x10] sm:$0xff]  ;;  %v541_v45 = vld [vmem:[%s2279_s26 + $0x18] sm:$0xff]  ;;  %496 = vst.msk [vmem:[#allocation2 + $0x38] sm:$0xff] %vm488_vm1, %v2181_v60 }
  0x37   : > { %1927 = vmatpush3.bf16.xpose.msra.mxu0 %v605_v31  ;;  %v602_v38 = vsel %vm521_vm0, %v2276_v29, 0  ;;  %v2301_v43 = vpack.c.bf16 %v547_v41, %v546_v40  ;;  %v542_v47 = vld [vmem:[%s2279_s26 + $0x20] sm:$0xff]  ;;  %v543_v48 = vld [vmem:[%s2279_s26 + $0x28] sm:$0xff]  ;;  %v564_v49 = vmul.f32 0.125, %v540_v44  ;;  %v565_v50 = vmul.f32 0.125, %v541_v45  ;;  %v544_v55 = vld [vmem:[%s2279_s26 + $0x30] sm:$0xff] }
  0x38   : > { %1991 = vmatprep.subr.msk.bf16.mxu0 %vm521_vm0, %v2276_v29  ;;  %v2289_v37 = vpack.c.bf16 %v563_v34, %v562_v33  ;;  %v599_v42 = vsel %vm521_vm0, %v2295_v39, 0  ;;  %v566_v51 = vmul.f32 0.125, %v542_v47  ;;  %v567_v52 = vmul.f32 0.125, %v543_v48  ;;  %v545_v56 = vld [vmem:[%s2279_s26 + $0x38] sm:$0xff]  ;;  %497 = vst.msk [vmem:[#allocation2 + $0x40] sm:$0xff] %vm488_vm1, %v2181_v60  ;;  %498 = vst.msk [vmem:[#allocation2 + $0x48] sm:$0xff] %vm488_vm1, %v2181_v60 }
  0x39   : > { %v596_v46 = vsel %vm521_vm0, %v2301_v43, 0  ;;  %v2311_v53 = vpack.c.bf16 %v565_v50, %v564_v49  ;;  %v568_v57 = vmul.f32 0.125, %v544_v55  ;;  %v569_v58 = vmul.f32 0.125, %v545_v56  ;;  %499 = vst.msk [vmem:[#allocation2 + $0x50] sm:$0xff] %vm488_vm1, %v2181_v60  ;;  %500 = vst.msk [vmem:[#allocation2 + $0x58] sm:$0xff] %vm488_vm1, %v2181_v60  ;;  %v2405_v15 = vld [vmem:[#allocation2 + $0x10] sm:$0xff] }
  0x3a   : > { %1934 = vmatprep.mubr.msk.bf16.mxu0 %vm521_vm0, %v2289_v37  ;;  %v2313_v54 = vpack.c.bf16 %v567_v52, %v566_v51  ;;  %501 = vst.msk [vmem:[#allocation2 + $0x60] sm:$0xff] %vm488_vm1, %v2181_v60  ;;  %502 = vst.msk [vmem:[#allocation2 + $0x68] sm:$0xff] %vm488_vm1, %v2181_v60  ;;  %v2407_v17 = vld [vmem:[#allocation2] sm:$0xff]  ;;  %v2412_v20 = vld [vmem:[#allocation2 + $0x18] sm:$0xff] }
  0x3b   : > { %v2321_v59 = vpack.c.bf16 %v569_v58, %v568_v57  ;;  %503 = vst.msk [vmem:[#allocation2 + $0x70] sm:$0xff] %vm488_vm1, %v2181_v60  ;;  %504 = vst.msk [vmem:[#allocation2 + $0x78] sm:$0xff] %vm488_vm1, %v2181_v60  ;;  %v2422_v24 = vld [vmem:[#allocation2 + $0x8] sm:$0xff]  ;;  %v2439_v32 = vld [vmem:[#allocation2 + $0x20] sm:$0xff] }
  0x3c   : > { %506 = vst.msk [vmem:[#allocation3 + $0x8] sm:$0xff] %vm488_vm1, %v2183_v14  ;;  %505 = vst.msk [vmem:[#allocation3] sm:$0xff] %vm488_vm1, %v2183_v14  ;;  %v560_v36 = vld [vmem:[%s2452_s27 + $0x30] sm:$0xff]  ;;  %v2458_v41 = vld [vmem:[#allocation2 + $0x28] sm:$0xff] }
  0x3d   : > { %507 = vst.msk [vmem:[#allocation3 + $0x10] sm:$0xff] %vm488_vm1, %v2183_v14  ;;  %508 = vst.msk [vmem:[#allocation3 + $0x18] sm:$0xff] %vm488_vm1, %v2183_v14  ;;  %v2456_v40 = vld [vmem:[#allocation2 + $0x30] sm:$0xff]  ;;  %v558_v48 = vld [vmem:[%s2452_s27 + $0x20] sm:$0xff] }
  0x3e   : > { %509 = vst.msk [vmem:[#allocation3 + $0x20] sm:$0xff] %vm488_vm1, %v2183_v14  ;;  %510 = vst.msk [vmem:[#allocation3 + $0x28] sm:$0xff] %vm488_vm1, %v2183_v14  ;;  %v559_v49 = vld [vmem:[%s2452_s27 + $0x28] sm:$0xff]  ;;  %v2479_v50 = vld [vmem:[#allocation2 + $0x38] sm:$0xff] }
  0x3f   : > { %1929 = vmatpush3.bf16.xpose.msra.mxu0 %v602_v38  ;;  %511 = vst.msk [vmem:[#allocation3 + $0x30] sm:$0xff] %vm488_vm1, %v2183_v14  ;;  %512 = vst.msk [vmem:[#allocation3 + $0x38] sm:$0xff] %vm488_vm1, %v2183_v14  ;;  %v561_v38 = vld [vmem:[%s2452_s27 + $0x38] sm:$0xff]  ;;  %v2481_v51 = vpack.c.bf16 %v559_v49, %v558_v48  ;;  %v556_v57 = vld [vmem:[%s2452_s27 + $0x10] sm:$0xff] }
  0x40   : > { %1992 = vmatprep.subr.msk.bf16.mxu0 %vm521_vm0, %v2295_v39  ;;  %513 = vst.msk [vmem:[#allocation3 + $0x40] sm:$0xff] %vm488_vm1, %v2183_v14  ;;  %514 = vst.msk [vmem:[#allocation3 + $0x48] sm:$0xff] %vm488_vm1, %v2183_v14  ;;  %v557_v58 = vld [vmem:[%s2452_s27 + $0x18] sm:$0xff] }
  0x41   : > { %515 = vst.msk [vmem:[#allocation3 + $0x50] sm:$0xff] %vm488_vm1, %v2183_v14  ;;  %516 = vst.msk [vmem:[#allocation3 + $0x58] sm:$0xff] %vm488_vm1, %v2183_v14  ;;  %v2501_v60 = vpack.c.bf16 %v557_v58, %v556_v57 }
  0x42   : > { %517 = vst.msk [vmem:[#allocation3 + $0x60] sm:$0xff] %vm488_vm1, %v2183_v14  ;;  %518 = vst.msk [vmem:[#allocation3 + $0x68] sm:$0xff] %vm488_vm1, %v2183_v14  ;;  %v2673_v30 = vld [vmem:[#allocation2 + $0x70] sm:$0xff] }
  0x43   : > { %519 = vst.msk [vmem:[#allocation3 + $0x70] sm:$0xff] %vm488_vm1, %v2183_v14  ;;  %520 = vst.msk [vmem:[#allocation3 + $0x78] sm:$0xff] %vm488_vm1, %v2183_v14 }
  0x44   : > { %522 = vst.msk [vmem:[#allocation4] sm:$0xff] %vm521_vm0, %v2183_v14  ;;  %523 = vst.msk [vmem:[#allocation4 + $0x8] sm:$0xff] %vm521_vm0, %v2183_v14 }
  0x45   : > { %524 = vst.msk [vmem:[#allocation4 + $0x10] sm:$0xff] %vm521_vm0, %v2183_v14  ;;  %525 = vst.msk [vmem:[#allocation4 + $0x18] sm:$0xff] %vm521_vm0, %v2183_v14 }
  0x46   : > { %526 = vst.msk [vmem:[#allocation4 + $0x20] sm:$0xff] %vm521_vm0, %v2183_v14  ;;  %527 = vst.msk [vmem:[#allocation4 + $0x28] sm:$0xff] %vm521_vm0, %v2183_v14 }
  0x47   : > { %1931 = vmatpush3.bf16.xpose.msra.mxu0 %v599_v42  ;;  %528 = vst.msk [vmem:[#allocation4 + $0x30] sm:$0xff] %vm521_vm0, %v2183_v14  ;;  %529 = vst.msk [vmem:[#allocation4 + $0x38] sm:$0xff] %vm521_vm0, %v2183_v14  ;;  %v2460_v42 = vpack.c.bf16 %v561_v38, %v560_v36 }
  0x48   : > { %1993 = vmatprep.subr.msk.bf16.mxu0 %vm521_vm0, %v2301_v43  ;;  %530 = vst.msk [vmem:[#allocation4 + $0x40] sm:$0xff] %vm521_vm0, %v2183_v14  ;;  %531 = vst.msk [vmem:[#allocation4 + $0x48] sm:$0xff] %vm521_vm0, %v2183_v14 }
  0x49   : > { %532 = vst.msk [vmem:[#allocation4 + $0x50] sm:$0xff] %vm521_vm0, %v2183_v14  ;;  %533 = vst.msk [vmem:[#allocation4 + $0x58] sm:$0xff] %vm521_vm0, %v2183_v14  ;;  %1942 = vmatprep.subr.bf16.mxu1 %v2460_v42 }
  0x4a   : > { %534 = vst.msk [vmem:[#allocation4 + $0x60] sm:$0xff] %vm521_vm0, %v2183_v14  ;;  %535 = vst.msk [vmem:[#allocation4 + $0x68] sm:$0xff] %vm521_vm0, %v2183_v14  ;;  %1943 = vmatpush3.bf16.msra.mxu1 %v2460_v42 }
  0x4b   : > { %536 = vst.msk [vmem:[#allocation4 + $0x70] sm:$0xff] %vm521_vm0, %v2183_v14  ;;  %537 = vst.msk [vmem:[#allocation4 + $0x78] sm:$0xff] %vm521_vm0, %v2183_v14  ;;  %1944 = vmatprep.subr.bf16.mxu1 %v2481_v51 }
  0x4e   : > { %1945 = vmatpush3.bf16.msra.mxu1 %v2481_v51 }
  0x4f   : > { %1933 = vmatpush3.bf16.xpose.msra.mxu0 %v596_v46  ;;  %1946 = vmatprep.subr.bf16.mxu1 %v2501_v60 }
  0x52   : > { %1947 = vmatpush3.bf16.msra.mxu1 %v2501_v60 }
  0x56   : > { %1935 = vmatmul.mubr.msk.bf16.vlgmr.msra.gmra.mxu0 %vm521_vm0, %v2311_v53 }
  0x57   : > { %1938 = vmatprep.mubr.msk.bf16.mxu0 %vm521_vm0, %v2313_v54 }
  0x5e   : > { %1939 = vmatmul.mubr.msk.bf16.gmra.mxu0 %vm521_vm0, %v2321_v59 }
 0x116   : > { %v2341_v61 = vpop.f32.mrf.mxu0 }
 0x117   : > { %v686_v62 = vsel %vm521_vm0, %v2341_v61, -inf }
 0x118   : > { %687 = vmax.xlane.f32.xlu1 %v686_v62  ;;  %v2345_v63 = vpop.f32.mrf.mxu0  ;;  %v2658_v62 = vld [vmem:[#allocation2 + $0x60] sm:$0xff] }
 0x119   : > { %v680_v0 = vsel %vm521_vm0, %v2345_v63, -inf }
 0x11a   : > { %681 = vmax.xlane.f32.xlu0 %v680_v0  ;;  %v2349_v1 = vpop.f32.mrf.mxu0  ;;  %v555_v0 = vld [vmem:[%s2452_s27 + $0x8] sm:$0xff] }
 0x11b   : > { %v689_v2 = vsel %vm521_vm0, %v2349_v1, -inf }
 0x11c   : > { %690 = vmax.xlane.f32.xlu1 %v689_v2  ;;  %v2353_v3 = vpop.f32.mrf.mxu0 }
 0x11d   : > { %v683_v4 = vsel %vm521_vm0, %v2353_v3, -inf }
 0x11e   : > { %684 = vmax.xlane.f32.xlu0 %v683_v4  ;;  %v2357_v5 = vpop.f32.mrf.mxu0 }
 0x11f   : > { %v698_v11 = vsel %vm521_vm0, %v2357_v5, -inf }
 0x120   : > { %v2359_v6 = vpop.f32.mrf.mxu0 }
 0x121   : > { %v692_v7 = vsel %vm521_vm0, %v2359_v6, -inf }
 0x122   : > { %693 = vmax.xlane.f32.xlu0 %v692_v7  ;;  %v2363_v8 = vpop.f32.mrf.mxu0 }
 0x123   : > { %v701_v13 = vsel %vm521_vm0, %v2363_v8, -inf }
 0x124   : > { %v2365_v10 = vpop.f32.mrf.mxu0 }
 0x125   : > { %v695_v12 = vsel %vm521_vm0, %v2365_v10, -inf }
 0x126   : > { %699 = vmax.xlane.f32.xlu0 %v698_v11  ;;  %696 = vmax.xlane.f32.xlu1 %v695_v12 }
 0x12a   : > { %702 = vmax.xlane.f32.xlu1 %v701_v13 }
 0x1a1   : > { %v688_v16 = vpop.xlane.xlu1 %687 }
 0x1a2   : > { %v2410_v18 = vmax.f32 %v2405_v15, %v688_v16 }
 0x1a3   : > { %v682_v19 = vpop.xlane.xlu0 %681 }
 0x1a4   : > { %1012 = vst.msk [vmem:[#allocation2 + $0x10] sm:$0xff] %vm488_vm1, %v2410_v18  ;;  %v2419_v22 = vmax.f32 %v2407_v17, %v682_v19  ;;  %748 = vperm.xlu1 %2044, %v2410_v18  }
 0x1a5   : > { %v691_v23 = vpop.xlane.xlu1 %690 }
 0x1a6   : > { %1010 = vst.msk [vmem:[#allocation2] sm:$0xff] %vm488_vm1, %v2419_v22  ;;  %v2429_v26 = vmax.f32 %v2412_v20, %v691_v23  ;;  %738 = vperm.xlu0 %2043, %v2419_v22  }
 0x1a7   : > { %v685_v28 = vpop.xlane.xlu0 %684 }
 0x1a8   : > { %1013 = vst.msk [vmem:[#allocation2 + $0x18] sm:$0xff] %vm488_vm1, %v2429_v26  ;;  %v2437_v31 = vmax.f32 %v2422_v24, %v685_v28 }
 0x1aa   : > { %1011 = vst.msk [vmem:[#allocation2 + $0x8] sm:$0xff] %vm488_vm1, %v2437_v31  ;;  %743 = vperm.xlu1 %2044, %v2437_v31   ;;  %1038 = vrot.lane.b32.xlu0 %v2276_v29, %s2184_s12  ;;  %v2675_v29 = vld [vmem:[#allocation2 + $0x78] sm:$0xff] }
 0x1ab   : > { %v694_v34 = vpop.xlane.xlu0 %693 }
 0x1ac   : > { %v2449_v35 = vmax.f32 %v2439_v32, %v694_v34 }
 0x1ae   : > { %1014 = vst.msk [vmem:[#allocation2 + $0x20] sm:$0xff] %vm488_vm1, %v2449_v35  ;;  %753 = vperm.xlu1 %2044, %v2429_v26   ;;  %1034 = vrot.lane.b32.xlu0 %v2301_v43, %s2184_s12 }
 0x1af   : > { %v700_v44 = vpop.xlane.xlu0 %699  ;;  %v697_v45 = vpop.xlane.xlu1 %696 }
 0x1b0   : > { %v2471_v46 = vmax.f32 %v2456_v40, %v700_v44  ;;  %v2474_v47 = vmax.f32 %v2458_v41, %v697_v45 }
 0x1b2   : > { %1016 = vst.msk [vmem:[#allocation2 + $0x30] sm:$0xff] %vm488_vm1, %v2471_v46  ;;  %1015 = vst.msk [vmem:[#allocation2 + $0x28] sm:$0xff] %vm488_vm1, %v2474_v47  ;;  %768 = vperm.xlu1 %2044, %v2471_v46   ;;  %1024 = vrot.lane.b32.xlu0 %v2311_v53, %s2184_s12  ;;  %v554_v53 = vld [vmem:[%s2452_s27] sm:$0xff] }
 0x1b3   : > { %v703_v55 = vpop.xlane.xlu1 %702  ;;  %v2514_v2 = vpack.c.bf16 %v555_v0, %v554_v53 }
 0x1b4   : > { %v2496_v56 = vmax.f32 %v2479_v50, %v703_v55 }
 0x1b5   : > { %1948 = vmatprep.subr.bf16.mxu1 %v2514_v2 }
 0x1b6   : > { %1017 = vst.msk [vmem:[#allocation2 + $0x38] sm:$0xff] %vm488_vm1, %v2496_v56  ;;  %758 = vperm.xlu1 %2044, %v2449_v35   ;;  %1028 = vrot.lane.b32.xlu0 %v2321_v59, %s2184_s12 }
 0x1b7   : > { %1949 = vmatpush3.bf16.msra.mxu1 %v2514_v2 }
 0x1ba   : > { %773 = vperm.xlu1 %2044, %v2496_v56  }
 0x1be   : > { %763 = vperm.xlu1 %2044, %v2474_v47  }
 0x1c2   : > { %1040 = vrot.lane.b32.xlu1 %v2274_v27, %s2184_s12 }
 0x1c6   : > { %1036 = vrot.lane.b32.xlu1 %v2295_v39, %s2184_s12 }
 0x1ca   : > { %1022 = vrot.lane.b32.xlu1 %v2289_v37, %s2184_s12 }
 0x1ce   : > { %1026 = vrot.lane.b32.xlu1 %v2313_v54, %s2184_s12 }
 0x21f   : > { %v749_v59 = vpop.permute.xlu1 %748 }
 0x220   : > { %v778_v9 = vsub.f32 %v2341_v61, %v749_v59 }
 0x221   : > { %v739_v4 = vpop.permute.xlu0 %738 }
 0x222   : > { %v776_v7 = vsub.f32 %v2345_v63, %v739_v4  ;;  %v788_v14 = vmul.f32 1.442695, %v778_v9 }
 0x224   : > { %v784_v11 = vmul.f32 1.442695, %v776_v7 }
 0x225   : > { %v744_v12 = vpop.permute.xlu1 %743  ;;  %v1039_v57 = vpop.permute.xlu0 %1038 }
 0x226   : > { %v777_v13 = vsub.f32 %v2353_v3, %v744_v12  ;;  %2045 = vpow2.f32 %v784_v11 }
 0x228   : > { %v786_v27 = vmul.f32 1.442695, %v777_v13 }
 0x229   : > { %v754_v39 = vpop.permute.xlu1 %753 }
 0x22a   : > { %2047 = vpow2.f32 %v786_v27  ;;  %v779_v37 = vsub.f32 %v2349_v1, %v754_v39  ;;  %v1035_v27 = vpop.permute.xlu0 %1034 }
 0x22b   : > { %2049 = vpow2.f32 %v788_v14  ;;  %v1055_v14 = vsel %vm521_vm0, %v1035_v27, 0 }
 0x22c   : > { %v790_v16 = vmul.f32 1.442695, %v779_v37 }
 0x22d   : > { %v769_v54 = vpop.permute.xlu1 %768 }
 0x22e   : > { %2051 = vpow2.f32 %v790_v16  ;;  %v782_v34 = vsub.f32 %v2357_v5, %v769_v54  ;;  %v1025_v39 = vpop.permute.xlu0 %1024 }
 0x230   : > { %v796_v49 = vmul.f32 1.442695, %v782_v34 }
 0x231   : > { %v759_v19 = vpop.permute.xlu1 %758 }
 0x232   : > { %v780_v63 = vsub.f32 %v2359_v6, %v759_v19  ;;  %v1029_v16 = vpop.permute.xlu0 %1028 }
 0x233   : > { %v2533_v61 = vpop.eup %2045 }
 0x234   : > { %v792_v36 = vmul.f32 1.442695, %v780_v63 }
 0x235   : > { %v774_v23 = vpop.permute.xlu1 %773 }
 0x236   : > { %v783_v28 = vsub.f32 %v2363_v8, %v774_v23  ;;  %2053 = vpow2.f32 %v792_v36 }
 0x237   : > { %v2536_v3 = vpop.eup %2047 }
 0x238   : > { %v913_v1 = vpack.c.bf16 %v2536_v3, %v2533_v61  ;;  %v798_v38 = vmul.f32 1.442695, %v783_v28  ;;  %v2541_v45 = vpop.eup %2049 }
 0x239   : > { %v764_v44 = vpop.permute.xlu1 %763 }
 0x23a   : > { %v781_v48 = vsub.f32 %v2365_v10, %v764_v44  ;;  %1950 = vmatprep.mubr.msk.bf16.mxu1 %vm521_vm0, %v913_v1  ;;  %2055 = vpow2.f32 %v798_v38  ;;  %v1061_v10 = vsel %vm521_vm0, %v1039_v57, 0 }
 0x23b   : > { %v2545_v6 = vpop.eup %2051 }
 0x23c   : > { %v794_v8 = vmul.f32 1.442695, %v781_v48  ;;  %v914_v5 = vpack.c.bf16 %v2545_v6, %v2541_v45 }
 0x23d   : > { %v1041_v55 = vpop.permute.xlu1 %1040 }
 0x23e   : > { %2057 = vpow2.f32 %v794_v8  ;;  %v1064_v58 = vsel %vm521_vm0, %v1041_v55, 0  ;;  %1951 = vmatmul.mubr.msk.bf16.vlgmr.msra.gmra.mxu1 %vm521_vm0, %v914_v5  ;;  %1994 = vmatprep.subr.msk.bf16.mxu1 %vm521_vm0, %v1041_v55 }
 0x23f   : > { %2059 = vpow2.f32 %v796_v49  ;;  %1959 = vmatpush3.bf16.xpose.msra.mxu1 %v1064_v58 }
 0x240   : > { %1995 = vmatprep.subr.msk.bf16.mxu1 %vm521_vm0, %v1039_v57 }
 0x241   : > { %v1037_v53 = vpop.permute.xlu1 %1036 }
 0x242   : > { %v1058_v11 = vsel %vm521_vm0, %v1037_v53, 0 }
 0x243   : > { %v2555_v0 = vpop.eup %2053 }
 0x245   : > { %v1023_v13 = vpop.permute.xlu1 %1022 }
 0x247   : > { %1961 = vmatpush3.bf16.xpose.msra.mxu1 %v1061_v10  ;;  %v2557_v59 = vpop.eup %2055 }
 0x248   : > { %1996 = vmatprep.subr.msk.bf16.mxu1 %vm521_vm0, %v1037_v53 }
 0x249   : > { %v1027_v37 = vpop.permute.xlu1 %1026 }
 0x24b   : > { %v2559_v4 = vpop.eup %2057 }
 0x24c   : > { %v2561_v7 = vpop.eup %2059  ;;  %v915_v9 = vpack.c.bf16 %v2559_v4, %v2555_v0 }
 0x24d   : > { %v916_v12 = vpack.c.bf16 %v2557_v59, %v2561_v7 }
 0x24e   : > { %1954 = vmatprep.mubr.msk.bf16.mxu1 %vm521_vm0, %v915_v9 }
 0x24f   : > { %1955 = vmatmul.mubr.msk.bf16.gmra.mxu1 %vm521_vm0, %v916_v12 }
 0x250   : > { %1963 = vmatpush3.bf16.xpose.msra.mxu1 %v1058_v11  ;;  %1966 = vmatprep.mubr.msk.bf16.mxu1 %vm521_vm0, %v1023_v13 }
 0x251   : > { %1997 = vmatprep.subr.msk.bf16.mxu1 %vm521_vm0, %v1035_v27 }
 0x258   : > { %1965 = vmatpush3.bf16.xpose.msra.mxu1 %v1055_v14  ;;  %v2624_v14 = vld [vmem:[#allocation2 + $0x40] sm:$0xff] }
 0x25f   : > { %1967 = vmatmul.mubr.msk.bf16.vlgmr.msra.gmra.mxu1 %vm521_vm0, %v1025_v39 }
 0x260   : > { %1970 = vmatprep.mubr.msk.bf16.mxu1 %vm521_vm0, %v1027_v37 }
 0x267   : > { %1971 = vmatmul.mubr.msk.bf16.gmra.mxu1 %vm521_vm0, %v1029_v16  ;;  %v2629_v16 = vld [vmem:[#allocation2 + $0x48] sm:$0xff] }
 0x2fe   : > { %v2576_v54 = vpop.f32.mrf.mxu1 }
 0x300   : > { %v2578_v19 = vpop.f32.mrf.mxu1 }
 0x302   : > { %v2580_v63 = vpop.f32.mrf.mxu1 }
 0x304   : > { %v2582_v23 = vpop.f32.mrf.mxu1 }
 0x30f   : > { %v2584_v28 = vpop.f32.mrf.mxu1 }
 0x310   : > { %2903 = vst [vmem:[#allocation8_spill] sm:$0xff] %v2584_v28 }
 0x311   : > { %v2586_v34 = vpop.f32.mrf.mxu1 }
 0x313   : > { %v2588_v36 = vpop.f32.mrf.mxu1 }
 0x314   : > { %2904 = vst [vmem:[#allocation9_spill] sm:$0xff] %v2588_v36 }
 0x315   : > { %v2590_v1 = vpop.f32.mrf.mxu1 }
 0x316   : > { %2905 = vst [vmem:[#allocation10_spill] sm:$0xff] %v2590_v1 }
 0x31f   : > { %v2592_v38 = vpop.f32.mrf.mxu1 }
 0x320   : > { %v1146_v10 = vsel %vm521_vm0, %v2592_v38, -inf }
 0x321   : > { %v2594_v44 = vpop.f32.mrf.mxu1 }
 0x322   : > { %v1140_v48 = vsel %vm521_vm0, %v2594_v44, -inf }
 0x323   : > { %1141 = vmax.xlane.f32.xlu1 %v1140_v48  ;;  %v2598_v49 = vpop.f32.mrf.mxu1  ;;  %v2631_v48 = vld [vmem:[#allocation2 + $0x58] sm:$0xff] }
 0x324   : > { %v1149_v5 = vsel %vm521_vm0, %v2598_v49, -inf }
 0x325   : > { %v2600_v8 = vpop.f32.mrf.mxu1 }
 0x326   : > { %v1143_v55 = vsel %vm521_vm0, %v2600_v8, -inf }
 0x327   : > { %1150 = vmax.xlane.f32.xlu1 %v1149_v5  ;;  %1144 = vmax.xlane.f32.xlu0 %v1143_v55  ;;  %v2606_v57 = vpop.f32.mrf.mxu1  ;;  %v2660_v5 = vld [vmem:[#allocation2 + $0x68] sm:$0xff] }
 0x328   : > { %v1158_v13 = vsel %vm521_vm0, %v2606_v57, -inf }
 0x329   : > { %v2608_v58 = vpop.f32.mrf.mxu1 }
 0x32a   : > { %v1152_v11 = vsel %vm521_vm0, %v2608_v58, -inf }
 0x32b   : > { %1147 = vmax.xlane.f32.xlu0 %v1146_v10  ;;  %v2612_v53 = vpop.f32.mrf.mxu1 }
 0x32c   : > { %v1161_v27 = vsel %vm521_vm0, %v2612_v53, -inf }
 0x32d   : > { %v2614_v9 = vpop.f32.mrf.mxu1 }
 0x32e   : > { %v1155_v12 = vsel %vm521_vm0, %v2614_v9, -inf }
 0x32f   : > { %1153 = vmax.xlane.f32.xlu0 %v1152_v11  ;;  %1156 = vmax.xlane.f32.xlu1 %v1155_v12 }
 0x333   : > { %1159 = vmax.xlane.f32.xlu0 %v1158_v13  ;;  %1162 = vmax.xlane.f32.xlu1 %v1161_v27  ;;  %v2644_v13 = vld [vmem:[#allocation2 + $0x50] sm:$0xff] }
 0x3ac   : > { %v1142_v39 = vpop.xlane.xlu1 %1141 }
 0x3ad   : > { %v2627_v37 = vmax.f32 %v2624_v14, %v1142_v39 }
 0x3af   : > { %1487 = vst.msk [vmem:[#allocation2 + $0x40] sm:$0xff] %vm488_vm1, %v2627_v37  ;;  %1198 = vperm.xlu0 %2043, %v2627_v37  }
 0x3b0   : > { %v1145_v55 = vpop.xlane.xlu0 %1144  ;;  %v1151_v10 = vpop.xlane.xlu1 %1150 }
 0x3b1   : > { %v2639_v11 = vmax.f32 %v2629_v16, %v1145_v55  ;;  %v2642_v12 = vmax.f32 %v2631_v48, %v1151_v10 }
 0x3b3   : > { %1488 = vst.msk [vmem:[#allocation2 + $0x48] sm:$0xff] %vm488_vm1, %v2639_v11  ;;  %1490 = vst.msk [vmem:[#allocation2 + $0x58] sm:$0xff] %vm488_vm1, %v2642_v12  ;;  %1213 = vperm.xlu0 %2043, %v2642_v12  }
 0x3b4   : > { %v1148_v55 = vpop.xlane.xlu0 %1147 }
 0x3b5   : > { %v2656_v10 = vmax.f32 %v2644_v13, %v1148_v55 }
 0x3b7   : > { %1489 = vst.msk [vmem:[#allocation2 + $0x50] sm:$0xff] %vm488_vm1, %v2656_v10  ;;  %1208 = vperm.xlu1 %2044, %v2656_v10  }
 0x3b8   : > { %v1154_v39 = vpop.xlane.xlu0 %1153  ;;  %v1157_v52 = vpop.xlane.xlu1 %1156 }
 0x3b9   : > { %v2668_v43 = vmax.f32 %v2658_v62, %v1154_v39  ;;  %v2671_v55 = vmax.f32 %v2660_v5, %v1157_v52 }
 0x3bb   : > { %1491 = vst.msk [vmem:[#allocation2 + $0x60] sm:$0xff] %vm488_vm1, %v2668_v43  ;;  %1492 = vst.msk [vmem:[#allocation2 + $0x68] sm:$0xff] %vm488_vm1, %v2671_v55  ;;  %1203 = vperm.xlu1 %2044, %v2639_v11   ;;  %1223 = vperm.xlu0 %2043, %v2671_v55  }
 0x3bc   : > { %v1160_v52 = vpop.xlane.xlu0 %1159  ;;  %v1163_v39 = vpop.xlane.xlu1 %1162 }
 0x3bd   : > { %v2688_v21 = vmax.f32 %v2673_v30, %v1160_v52  ;;  %v2691_v27 = vmax.f32 %v2675_v29, %v1163_v39  ;;  %v819_v52 = vsel %vm521_vm0, %v2536_v3, 0.0  ;;  %v822_v39 = vsel %vm521_vm0, %v2541_v45, 0.0 }
 0x3bf   : > { %1493 = vst.msk [vmem:[#allocation2 + $0x70] sm:$0xff] %vm488_vm1, %v2688_v21  ;;  %1494 = vst.msk [vmem:[#allocation2 + $0x78] sm:$0xff] %vm488_vm1, %v2691_v27  ;;  %1228 = vperm.xlu1 %2044, %v2688_v21   ;;  %1233 = vperm.xlu0 %2043, %v2691_v27  }
 0x3c3   : > { %1218 = vperm.xlu1 %2044, %v2668_v43   ;;  %1386 = vrot.lane.b32.xlu0 %v2481_v51, %s2184_s12  ;;  %v816_v51 = vsel %vm521_vm0, %v2533_v61, 0.0 }
 0x3c7   : > { %1388 = vrot.lane.b32.xlu1 %v2460_v42, %s2184_s12  ;;  %1382 = vrot.lane.b32.xlu0 %v2514_v2, %s2184_s12  ;;  %v825_v42 = vsel %vm521_vm0, %v2545_v6, 0.0 }
 0x3cb   : > { %1384 = vrot.lane.b32.xlu1 %v2501_v60, %s2184_s12 }
 0x3e6   : > { %820 = vadd.xlane.f32.xlu0 %v819_v52 }
 0x3ea   : > { %823 = vadd.xlane.f32.xlu0 %v822_v39 }
 0x3ef   : > { %817 = vadd.xlane.f32.xlu1 %v816_v51 }
 0x3f3   : > { %826 = vadd.xlane.f32.xlu1 %v825_v42 }
 0x42a   : > { %v1199_v2 = vpop.permute.xlu0 %1198 }
 0x42b   : > { %v1236_v33 = vsub.f32 %v2594_v44, %v1199_v2 }
 0x42d   : > { %v1244_v39 = vmul.f32 1.442695, %v1236_v33 }
 0x42e   : > { %v1214_v25 = vpop.permute.xlu0 %1213 }
 0x42f   : > { %v1239_v60 = vsub.f32 %v2598_v49, %v1214_v25 }
 0x431   : > { %v1250_v3 = vmul.f32 1.442695, %v1239_v60 }
 0x432   : > { %v1209_v52 = vpop.permute.xlu1 %1208 }
 0x433   : > { %2061 = vpow2.f32 %v1250_v3  ;;  %v1238_v45 = vsub.f32 %v2592_v38, %v1209_v52 }
 0x435   : > { %v1248_v36 = vmul.f32 1.442695, %v1238_v45 }
 0x436   : > { %v1224_v1 = vpop.permute.xlu0 %1223  ;;  %v1204_v61 = vpop.permute.xlu1 %1203 }
 0x437   : > { %2063 = vpow2.f32 %v1248_v36  ;;  %v1241_v51 = vsub.f32 %v2614_v9, %v1224_v1  ;;  %v1237_v6 = vsub.f32 %v2600_v8, %v1204_v61 }
 0x438   : > { %2065 = vpow2.f32 %v1244_v39 }
 0x439   : > { %v1246_v42 = vmul.f32 1.442695, %v1237_v6  ;;  %v1254_v28 = vmul.f32 1.442695, %v1241_v51 }
 0x43a   : > { %v1234_v25 = vpop.permute.xlu0 %1233  ;;  %v1229_v49 = vpop.permute.xlu1 %1228 }
 0x43b   : > { %v1243_v44 = vsub.f32 %v2612_v53, %v1234_v25  ;;  %2067 = vpow2.f32 %v1246_v42  ;;  %v1242_v2 = vsub.f32 %v2606_v57, %v1229_v49 }
 0x43c   : > { %2069 = vpow2.f32 %v1254_v28 }
 0x43d   : > { %v1258_v33 = vmul.f32 1.442695, %v1243_v44  ;;  %v1256_v3 = vmul.f32 1.442695, %v1242_v2 }
 0x43e   : > { %v1219_v38 = vpop.permute.xlu1 %1218  ;;  %v1387_v52 = vpop.permute.xlu0 %1386 }
 0x43f   : > { %v1240_v60 = vsub.f32 %v2608_v58, %v1219_v38  ;;  %2071 = vpow2.f32 %v1258_v33 }
 0x440   : > { %v2062_v36 = vpop.eup %2061 }
 0x441   : > { %v1252_v1 = vmul.f32 1.442695, %v1240_v60  ;;  %v1286_v8 = vsel %vm521_vm0, %v2062_v36, 0.0 }
 0x442   : > { %1287 = vadd.xlane.f32.xlu1 %v1286_v8  ;;  %v1389_v9 = vpop.permute.xlu1 %1388  ;;  %v1383_v6 = vpop.permute.xlu0 %1382  ;;  %v831_v8 = vsel %vm521_vm0, %v2559_v4, 0.0  ;;  %v834_v4 = vsel %vm521_vm0, %v2561_v7, 0.0 }
 0x443   : > { %2073 = vpow2.f32 %v1252_v1  ;;  %1974 = vmatprep.subr.bf16.mxu0 %v1389_v9 }
 0x444   : > { %v2064_v53 = vpop.eup %2063  ;;  %1975 = vmatpush3.bf16.msra.mxu0 %v1389_v9  ;;  %2075 = vpow2.f32 %v1256_v3 }
 0x445   : > { %v1283_v28 = vsel %vm521_vm0, %v2064_v53, 0.0  ;;  %1976 = vmatprep.subr.bf16.mxu0 %v1387_v52  ;;  %v2066_v57 = vpop.eup %2065  ;;  %v1375_v2 = vpack.c.bf16 %v2062_v36, %v2064_v53  ;;  %v828_v36 = vsel %vm521_vm0, %v2555_v0, 0.0  ;;  %v2909_v0 = vsub.f32 %v2439_v32, %v2449_v35 }
 0x446   : > { %1284 = vadd.xlane.f32.xlu0 %v1283_v28  ;;  %v1385_v58 = vpop.permute.xlu1 %1384  ;;  %v1277_v39 = vsel %vm521_vm0, %v2066_v57, 0.0  ;;  %v837_v28 = vsel %vm521_vm0, %v2557_v59, 0.0  ;;  %v2913_v32 = vsub.f32 %v2624_v14, %v2627_v37  ;;  %v2916_v14 = vsub.f32 %v2629_v16, %v2639_v11 }
 0x447   : > { %v728_v59 = vmul.f32 1.442695, %v2909_v0  ;;  %v2918_v16 = vsub.f32 %v2631_v48, %v2642_v12  ;;  %v2920_v12 = vsub.f32 %v2660_v5, %v2671_v55 }
 0x448   : > { %1977 = vmatpush3.bf16.msra.mxu0 %v1387_v52  ;;  %v2068_v45 = vpop.eup %2067  ;;  %v2906_v52 = vsub.f32 %v2422_v24, %v2437_v31  ;;  %v2908_v24 = vsub.f32 %v2407_v17, %v2419_v22  ;;  %v2912_v17 = vsub.f32 %v2458_v41, %v2474_v47  ;;  %v1180_v35 = vmul.f32 1.442695, %v2913_v32  ;;  %v1262_v32 = vld [vmem:[#allocation3 + $0x48] sm:$0xff] }
 0x449   : > { %1978 = vmatprep.subr.bf16.mxu0 %v1385_v58  ;;  %v1280_v61 = vsel %vm521_vm0, %v2068_v45, 0.0  ;;  %v1374_v51 = vpack.c.bf16 %v2068_v45, %v2066_v57  ;;  %v2070_v42 = vpop.eup %2069  ;;  %v2907_v57 = vsub.f32 %v2405_v15, %v2410_v18  ;;  %v2910_v45 = vsub.f32 %v2412_v20, %v2429_v26 }
 0x44a   : > { %1278 = vadd.xlane.f32.xlu0 %v1277_v39  ;;  %1281 = vadd.xlane.f32.xlu1 %v1280_v61  ;;  %v1292_v25 = vsel %vm521_vm0, %v2070_v42, 0.0  ;;  %v722_v53 = vmul.f32 1.442695, %v2906_v52  ;;  %v720_v31 = vmul.f32 1.442695, %v2908_v24  ;;  %v2911_v15 = vsub.f32 %v2456_v40, %v2471_v46  ;;  %v801_v61 = vld [vmem:[#allocation3 + $0x8] sm:$0xff] }
 0x44b   : > { %1982 = vmatprep.mubr.msk.bf16.mxu0 %vm521_vm0, %v1374_v51  ;;  %v726_v7 = vmul.f32 1.442695, %v2910_v45  ;;  %v730_v22 = vmul.f32 1.442695, %v2912_v17  ;;  %v2914_v20 = vsub.f32 %v2479_v50, %v2496_v56  ;;  %v2915_v40 = vsub.f32 %v2644_v13, %v2656_v10  ;;  %v1263_v45 = vld [vmem:[#allocation3 + $0x50] sm:$0xff]  ;;  %v1261_v17 = vld [vmem:[#allocation3 + $0x40] sm:$0xff] }
 0x44c   : > { %1979 = vmatpush3.bf16.msra.mxu0 %v1385_v58  ;;  %v2072_v49 = vpop.eup %2071  ;;  %v724_v58 = vmul.f32 1.442695, %v2907_v57  ;;  %2077 = vpow2.f32 %v722_v53  ;;  %v732_v18 = vmul.f32 1.442695, %v2911_v15  ;;  %v1182_v37 = vmul.f32 1.442695, %v2916_v14 }
 0x44d   : > { %1980 = vmatprep.subr.bf16.mxu0 %v1383_v6  ;;  %v1298_v3 = vsel %vm521_vm0, %v2072_v49, 0.0  ;;  %v734_v26 = vmul.f32 1.442695, %v2914_v20  ;;  %v1184_v46 = vmul.f32 1.442695, %v2915_v40  ;;  %v2917_v50 = vsub.f32 %v2658_v62, %v2668_v43  ;;  %v1266_v40 = vld [vmem:[#allocation3 + $0x68] sm:$0xff] }
 0x44e   : > { %1293 = vadd.xlane.f32.xlu1 %v1292_v25  ;;  %2079 = vpow2.f32 %v724_v58  ;;  %v1186_v11 = vmul.f32 1.442695, %v2918_v16  ;;  %v2919_v43 = vsub.f32 %v2673_v30, %v2688_v21 }
 0x44f   : > { %2081 = vpow2.f32 %v720_v31  ;;  %v1188_v56 = vmul.f32 1.442695, %v2917_v50 }
 0x450   : > { %v2074_v44 = vpop.eup %2073  ;;  %1981 = vmatpush3.bf16.msra.mxu0 %v1383_v6  ;;  %2083 = vpow2.f32 %v728_v59  ;;  %v802_v6 = vld [vmem:[#allocation3 + $0x10] sm:$0xff]  ;;  %v1192_v62 = vmul.f32 1.442695, %v2919_v43 }
 0x451   : > { %v1289_v33 = vsel %vm521_vm0, %v2074_v44, 0.0  ;;  %v1376_v38 = vpack.c.bf16 %v2070_v42, %v2074_v44  ;;  %v2076_v60 = vpop.eup %2075  ;;  %2085 = vpow2.f32 %v726_v7 }
 0x452   : > { %1290 = vadd.xlane.f32.xlu0 %v1289_v33  ;;  %1299 = vadd.xlane.f32.xlu1 %v1298_v3  ;;  %v1295_v1 = vsel %vm521_vm0, %v2076_v60, 0.0  ;;  %v1377_v9 = vpack.c.bf16 %v2072_v49, %v2076_v60  ;;  %2087 = vpow2.f32 %v732_v18 }
 0x453   : > { %1983 = vmatmul.mubr.msk.bf16.vlgmr.msra.gmra.mxu0 %vm521_vm0, %v1375_v2  ;;  %2089 = vpow2.f32 %v730_v22  ;;  %v800_v2 = vld [vmem:[#allocation3] sm:$0xff] }
 0x454   : > { %1986 = vmatprep.mubr.msk.bf16.mxu0 %vm521_vm0, %v1376_v38  ;;  %2091 = vpow2.f32 %v1180_v35 }
 0x455   : > { %2093 = vpow2.f32 %v734_v26 }
 0x456   : > { %1296 = vadd.xlane.f32.xlu0 %v1295_v1  ;;  %832 = vadd.xlane.f32.xlu1 %v831_v8  ;;  %2095 = vpow2.f32 %v1184_v46  ;;  %v803_v1 = vld [vmem:[#allocation3 + $0x18] sm:$0xff] }
 0x457   : > { %2097 = vpow2.f32 %v1182_v37 }
 0x458   : > { %2099 = vpow2.f32 %v1188_v56 }
 0x459   : > { %v2078_v39 = vpop.eup %2077  ;;  %2101 = vpow2.f32 %v1186_v11 }
 0x45a   : > { %829 = vadd.xlane.f32.xlu0 %v828_v36  ;;  %838 = vadd.xlane.f32.xlu1 %v837_v28  ;;  %v809_v41 = vmul.f32 %v2078_v39, %v801_v61  ;;  %v1190_v36 = vmul.f32 1.442695, %v2920_v12  ;;  %2103 = vpow2.f32 %v1192_v62  ;;  %v2921_v28 = vsub.f32 %v2675_v29, %v2691_v27  ;;  %v1264_v29 = vld [vmem:[#allocation3 + $0x58] sm:$0xff] }
 0x45b   : > { %1987 = vmatmul.mubr.msk.bf16.gmra.mxu0 %vm521_vm0, %v1377_v9  ;;  %v2080_v47 = vpop.eup %2079  ;;  %v807_v12 = vld [vmem:[#allocation3 + $0x38] sm:$0xff] }
 0x45c   : > { %v2082_v25 = vpop.eup %2081  ;;  %v810_v13 = vmul.f32 %v2080_v47, %v802_v6  ;;  %2105 = vpow2.f32 %v1190_v36 }
 0x45d   : > { %v2785_v10 = vpop.eup %2083  ;;  %v808_v60 = vmul.f32 %v2082_v25, %v800_v2  ;;  %v805_v2 = vld [vmem:[#allocation3 + $0x28] sm:$0xff] }
 0x45e   : > { %835 = vadd.xlane.f32.xlu0 %v834_v4  ;;  %v2086_v33 = vpop.eup %2085  ;;  %v1194_v4 = vmul.f32 1.442695, %v2921_v28 }
 0x45f   : > { %v2795_v38 = vpop.eup %2087  ;;  %v811_v30 = vmul.f32 %v2086_v33, %v803_v1 }
 0x460   : > { %v2798_v48 = vpop.eup %2089  ;;  %2107 = vpow2.f32 %v1194_v4  ;;  %v806_v4 = vld [vmem:[#allocation3 + $0x30] sm:$0xff] }
 0x461   : > { %v2092_v21 = vpop.eup %2091 }
 0x462   : > { %v2805_v53 = vpop.eup %2093  ;;  %v1269_v35 = vmul.f32 %v2092_v21, %v1261_v17 }
 0x463   : > { %v2096_v57 = vpop.eup %2095  ;;  %v815_v28 = vmul.f32 %v2805_v53, %v807_v12 }
 0x464   : > { %v2098_v5 = vpop.eup %2097  ;;  %v1271_v15 = vmul.f32 %v2096_v57, %v1263_v45 }
 0x465   : > { %v2100_v55 = vpop.eup %2099  ;;  %v1270_v61 = vmul.f32 %v2098_v5, %v1262_v32 }
 0x466   : > { %v2102_v58 = vpop.eup %2101 }
 0x467   : > { %v2104_v24 = vpop.eup %2103  ;;  %v1272_v27 = vmul.f32 %v2102_v58, %v1264_v29 }
 0x469   : > { %v2106_v31 = vpop.eup %2105 }
 0x46b   : > { %872 = vperm.xlu1 %2044, %v2078_v39  }
 0x46d   : > { %v2108_v0 = vpop.eup %2107 }
 0x46f   : > { %v821_v51 = vpop.xlane.xlu0 %820  ;;  %877 = vperm.xlu1 %2044, %v2080_v47   ;;  %v1274_v47 = vmul.f32 %v2106_v31, %v1266_v40 }
 0x470   : > { %v841_v42 = vadd.f32 %v821_v51, %v809_v41  ;;  %v1265_v51 = vld [vmem:[#allocation3 + $0x60] sm:$0xff] }
 0x472   : > { %850 = vst.msk [vmem:[#allocation3 + $0x8] sm:$0xff] %vm488_vm1, %v841_v42  ;;  %v1268_v42 = vld [vmem:[#allocation3 + $0x78] sm:$0xff] }
 0x473   : > { %v824_v49 = vpop.xlane.xlu0 %823  ;;  %887 = vperm.xlu1 %2044, %v2785_v10   ;;  %v1276_v56 = vmul.f32 %v2108_v0, %v1268_v42 }
 0x474   : > { %v842_v44 = vadd.f32 %v824_v49, %v810_v13  ;;  %867 = vperm.xlu0 %2043, %v2082_v25   ;;  %v1273_v25 = vmul.f32 %v2100_v55, %v1265_v51  ;;  %v1267_v13 = vld [vmem:[#allocation3 + $0x70] sm:$0xff] }
 0x476   : > { %851 = vst.msk [vmem:[#allocation3 + $0x10] sm:$0xff] %vm488_vm1, %v842_v44 }
 0x477   : > { %897 = vperm.xlu1 %2044, %v2795_v38  }
 0x478   : > { %882 = vperm.xlu0 %2043, %v2086_v33   ;;  %v818_v3 = vpop.xlane.xlu1 %817  ;;  %v1275_v33 = vmul.f32 %v2104_v24, %v1267_v13 }
 0x479   : > { %v840_v8 = vadd.f32 %v818_v3, %v808_v60  ;;  %v813_v60 = vmul.f32 %v2798_v48, %v805_v2  ;;  %v804_v3 = vld [vmem:[#allocation3 + $0x20] sm:$0xff] }
 0x47b   : > { %849 = vst.msk [vmem:[#allocation3] sm:$0xff] %vm488_vm1, %v840_v8  ;;  %1328 = vperm.xlu1 %2044, %v2092_v21   ;;  %v812_v21 = vmul.f32 %v2785_v10, %v804_v3 }
 0x47c   : > { %892 = vperm.xlu0 %2043, %v2798_v48   ;;  %v827_v9 = vpop.xlane.xlu1 %826 }
 0x47d   : > { %v843_v52 = vadd.f32 %v827_v9, %v811_v30  ;;  %v1500_v40 = vld [vmem:[#allocation3 + $0x10] sm:$0xff] }
 0x47f   : > { %852 = vst.msk [vmem:[#allocation3 + $0x18] sm:$0xff] %vm488_vm1, %v843_v52  ;;  %1338 = vperm.xlu1 %2044, %v2096_v57  }
 0x480   : > { %902 = vperm.xlu0 %2043, %v2805_v53  }
 0x483   : > { %1348 = vperm.xlu1 %2044, %v2100_v55  }
 0x484   : > { %1333 = vperm.xlu0 %2043, %v2098_v5  }
 0x486   : > { %v1501_v32 = vld [vmem:[#allocation3 + $0x18] sm:$0xff] }
 0x487   : > { %1358 = vperm.xlu1 %2044, %v2104_v24   ;;  %v858_v24 = vld [vmem:[#allocation4 + $0x8] sm:$0xff] }
 0x488   : > { %1343 = vperm.xlu0 %2043, %v2102_v58   ;;  %v814_v58 = vmul.f32 %v2795_v38, %v806_v4 }
 0x48c   : > { %1353 = vperm.xlu0 %2043, %v2106_v31  }
 0x490   : > { %1363 = vperm.xlu0 %2043, %v2108_v0  }
 0x4cb   : > { %v1288_v59 = vpop.xlane.xlu1 %1287 }
 0x4cc   : > { %v1304_v7 = vadd.f32 %v1288_v59, %v1272_v27  ;;  %v1499_v27 = vld [vmem:[#allocation3 + $0x8] sm:$0xff] }
 0x4ce   : > { %1312 = vst.msk [vmem:[#allocation3 + $0x58] sm:$0xff] %vm488_vm1, %v1304_v7  ;;  %v859_v7 = vld [vmem:[#allocation4 + $0x10] sm:$0xff] }
 0x4cf   : > { %v1285_v18 = vpop.xlane.xlu0 %1284 }
 0x4d0   : > { %v1303_v22 = vadd.f32 %v1285_v18, %v1271_v15  ;;  %v1498_v18 = vld [vmem:[#allocation3] sm:$0xff] }
 0x4d2   : > { %1311 = vst.msk [vmem:[#allocation3 + $0x50] sm:$0xff] %vm488_vm1, %v1303_v22 }
 0x4d3   : > { %v1279_v39 = vpop.xlane.xlu0 %1278  ;;  %v1282_v26 = vpop.xlane.xlu1 %1281 }
 0x4d4   : > { %v1301_v20 = vadd.f32 %v1279_v39, %v1269_v35  ;;  %v1302_v46 = vadd.f32 %v1282_v26, %v1270_v61  ;;  %v857_v39 = vld [vmem:[#allocation4] sm:$0xff] }
 0x4d5   : > { %v1573_v41 = vld [vmem:[#allocation3 + $0x58] sm:$0xff]  ;;  %v861_v61 = vld [vmem:[#allocation4 + $0x20] sm:$0xff] }
 0x4d6   : > { %1309 = vst.msk [vmem:[#allocation3 + $0x40] sm:$0xff] %vm488_vm1, %v1301_v20  ;;  %2109 = vrcp.f32 %v1573_v41  ;;  %1310 = vst.msk [vmem:[#allocation3 + $0x48] sm:$0xff] %vm488_vm1, %v1302_v46 }
 0x4d7   : > { %v1294_v6 = vpop.xlane.xlu1 %1293 }
 0x4d8   : > { %v1306_v14 = vadd.f32 %v1294_v6, %v1274_v47  ;;  %v860_v6 = vld [vmem:[#allocation4 + $0x18] sm:$0xff] }
 0x4d9   : > { %v1572_v37 = vld [vmem:[#allocation3 + $0x50] sm:$0xff] }
 0x4da   : > { %2111 = vrcp.f32 %v1572_v37  ;;  %1314 = vst.msk [vmem:[#allocation3 + $0x68] sm:$0xff] %vm488_vm1, %v1306_v14  ;;  %v863_v14 = vld [vmem:[#allocation4 + $0x30] sm:$0xff] }
 0x4db   : > { %v1291_v50 = vpop.xlane.xlu0 %1290  ;;  %v1300_v44 = vpop.xlane.xlu1 %1299 }
 0x4dc   : > { %v1305_v49 = vadd.f32 %v1291_v50, %v1273_v25  ;;  %v1308_v16 = vadd.f32 %v1300_v44, %v1276_v56 }
 0x4dd   : > { %v1570_v11 = vld [vmem:[#allocation3 + $0x40] sm:$0xff]  ;;  %v1571_v43 = vld [vmem:[#allocation3 + $0x48] sm:$0xff] }
 0x4de   : > { %1313 = vst.msk [vmem:[#allocation3 + $0x60] sm:$0xff] %vm488_vm1, %v1305_v49  ;;  %2113 = vrcp.f32 %v1570_v11  ;;  %1316 = vst.msk [vmem:[#allocation3 + $0x78] sm:$0xff] %vm488_vm1, %v1308_v16 }
 0x4df   : > { %v1297_v62 = vpop.xlane.xlu0 %1296  ;;  %2115 = vrcp.f32 %v1571_v43  ;;  %v833_v8 = vpop.xlane.xlu1 %832 }
 0x4e0   : > { %v1307_v1 = vadd.f32 %v1297_v62, %v1275_v33  ;;  %v845_v36 = vadd.f32 %v833_v8, %v813_v60  ;;  %v2923_v8 = vld [vmem:[#allocation10_spill] sm:$0xff] }
 0x4e1   : > { %v1575_v30 = vld [vmem:[#allocation3 + $0x68] sm:$0xff] }
 0x4e2   : > { %1315 = vst.msk [vmem:[#allocation3 + $0x70] sm:$0xff] %vm488_vm1, %v1307_v1  ;;  %854 = vst.msk [vmem:[#allocation3 + $0x28] sm:$0xff] %vm488_vm1, %v845_v36  ;;  %2117 = vrcp.f32 %v1575_v30  ;;  %v864_v1 = vld [vmem:[#allocation4 + $0x38] sm:$0xff] }
 0x4e3   : > { %v2110_v9 = vpop.eup %2109  ;;  %v830_v52 = vpop.xlane.xlu0 %829 }
 0x4e4   : > { %v844_v48 = vadd.f32 %v830_v52, %v812_v21  ;;  %v839_v57 = vpop.xlane.xlu1 %838  ;;  %1611 = vperm.xlu0 %2043, %v2110_v9   ;;  %v2924_v9 = vld [vmem:[#allocation9_spill] sm:$0xff] }
 0x4e5   : > { %v847_v5 = vadd.f32 %v839_v57, %v815_v28  ;;  %v1574_v55 = vld [vmem:[#allocation3 + $0x60] sm:$0xff]  ;;  %v1577_v10 = vld [vmem:[#allocation3 + $0x78] sm:$0xff] }
 0x4e6   : > { %853 = vst.msk [vmem:[#allocation3 + $0x20] sm:$0xff] %vm488_vm1, %v844_v48  ;;  %2119 = vrcp.f32 %v1574_v55 }
 0x4e7   : > { %v2112_v31 = vpop.eup %2111  ;;  %856 = vst.msk [vmem:[#allocation3 + $0x38] sm:$0xff] %vm488_vm1, %v847_v5  ;;  %v836_v0 = vpop.xlane.xlu0 %835  ;;  %2121 = vrcp.f32 %v1577_v10  ;;  %v1320_v10 = vld [vmem:[#allocation4 + $0x50] sm:$0xff] }
 0x4e8   : > { %v846_v53 = vadd.f32 %v836_v0, %v814_v58  ;;  %v873_v29 = vpop.permute.xlu1 %872  ;;  %1606 = vperm.xlu1 %2044, %v2112_v31   ;;  %v1318_v0 = vld [vmem:[#allocation4 + $0x40] sm:$0xff] }
 0x4e9   : > { %v906_v59 = vmul.f32 %v873_v29, %v858_v24  ;;  %v1576_v45 = vld [vmem:[#allocation3 + $0x70] sm:$0xff]  ;;  %v1503_v47 = vld [vmem:[#allocation3 + $0x28] sm:$0xff] }
 0x4ea   : > { %855 = vst.msk [vmem:[#allocation3 + $0x30] sm:$0xff] %vm488_vm1, %v846_v53  ;;  %2123 = vrcp.f32 %v1576_v45 }
 0x4eb   : > { %v2114_v15 = vpop.eup %2113  ;;  %v995_v38 = vadd.f32 %v2582_v23, %v906_v59  ;;  %2125 = vrcp.f32 %v1499_v27  ;;  %v1321_v27 = vld [vmem:[#allocation4 + $0x58] sm:$0xff] }
 0x4ec   : > { %v2116_v17 = vpop.eup %2115  ;;  %v878_v22 = vpop.permute.xlu1 %877  ;;  %1596 = vperm.xlu1 %2044, %v2114_v15   ;;  %2127 = vrcp.f32 %v1498_v18  ;;  %v1319_v15 = vld [vmem:[#allocation4 + $0x48] sm:$0xff] }
 0x4ed   : > { %1003 = vst.msk [vmem:[#allocation4 + $0x8] sm:$0xff] %vm521_vm0, %v995_v38  ;;  %v907_v35 = vmul.f32 %v878_v22, %v859_v7  ;;  %1601 = vperm.xlu0 %2043, %v2116_v17   ;;  %2129 = vrcp.f32 %v1501_v32  ;;  %v1502_v50 = vld [vmem:[#allocation3 + $0x20] sm:$0xff]  ;;  %v1324_v32 = vld [vmem:[#allocation4 + $0x70] sm:$0xff] }
 0x4ee   : > { %2131 = vrcp.f32 %v1500_v40  ;;  %v1505_v44 = vld [vmem:[#allocation3 + $0x38] sm:$0xff] }
 0x4ef   : > { %v996_v20 = vadd.f32 %v2576_v54, %v907_v35  ;;  %v868_v26 = vpop.permute.xlu0 %867  ;;  %v2118_v46 = vpop.eup %2117  ;;  %2133 = vrcp.f32 %v1503_v47 }
 0x4f0   : > { %v905_v23 = vmul.f32 %v868_v26, %v857_v39  ;;  %v888_v41 = vpop.permute.xlu1 %887  ;;  %2135 = vrcp.f32 %v1502_v50  ;;  %v1322_v26 = vld [vmem:[#allocation4 + $0x60] sm:$0xff] }
 0x4f1   : > { %1004 = vst.msk [vmem:[#allocation4 + $0x10] sm:$0xff] %vm521_vm0, %v996_v20  ;;  %v909_v51 = vmul.f32 %v888_v41, %v861_v61  ;;  %1621 = vperm.xlu0 %2043, %v2118_v46   ;;  %2137 = vrcp.f32 %v1505_v44  ;;  %v1504_v62 = vld [vmem:[#allocation3 + $0x30] sm:$0xff]  ;;  %v1325_v41 = vld [vmem:[#allocation4 + $0x78] sm:$0xff] }
 0x4f2   : > { %v994_v42 = vadd.f32 %v2578_v19, %v905_v23  ;;  %v862_v19 = vld [vmem:[#allocation4 + $0x28] sm:$0xff]  ;;  %2139 = vrcp.f32 %v1504_v62 }
 0x4f3   : > { %v2120_v37 = vpop.eup %2119  ;;  %v998_v25 = vadd.f32 %v2586_v34, %v909_v51  ;;  %v883_v54 = vpop.permute.xlu0 %882  ;;  %v2922_v34 = vld [vmem:[#allocation8_spill] sm:$0xff] }
 0x4f4   : > { %v2122_v56 = vpop.eup %2121  ;;  %1002 = vst.msk [vmem:[#allocation4] sm:$0xff] %vm521_vm0, %v994_v42  ;;  %v908_v13 = vmul.f32 %v883_v54, %v860_v6  ;;  %v898_v49 = vpop.permute.xlu1 %897  ;;  %1616 = vperm.xlu1 %2044, %v2120_v37  }
 0x4f5   : > { %1006 = vst.msk [vmem:[#allocation4 + $0x20] sm:$0xff] %vm521_vm0, %v998_v25  ;;  %v911_v2 = vmul.f32 %v898_v49, %v863_v14  ;;  %1631 = vperm.xlu0 %2043, %v2122_v56   ;;  %v1323_v14 = vld [vmem:[#allocation4 + $0x68] sm:$0xff] }
 0x4f6   : > { %v997_v16 = vadd.f32 %v2580_v63, %v908_v13 }
 0x4f7   : > { %v2124_v11 = vpop.eup %2123  ;;  %v1000_v33 = vadd.f32 %v2922_v34, %v911_v2  ;;  %v893_v43 = vpop.permute.xlu0 %892 }
 0x4f8   : > { %v2126_v60 = vpop.eup %2125  ;;  %1005 = vst.msk [vmem:[#allocation4 + $0x18] sm:$0xff] %vm521_vm0, %v997_v16  ;;  %v910_v3 = vmul.f32 %v893_v43, %v862_v19  ;;  %1626 = vperm.xlu1 %2044, %v2124_v11   ;;  %v1329_v5 = vpop.permute.xlu1 %1328 }
 0x4f9   : > { %1008 = vst.msk [vmem:[#allocation4 + $0x30] sm:$0xff] %vm521_vm0, %v1000_v33  ;;  %1529 = vperm.xlu0 %2043, %v2126_v60   ;;  %v2128_v63 = vpop.eup %2127  ;;  %v1366_v45 = vmul.f32 %v1329_v5, %v1318_v0 }
 0x4fa   : > { %v999_v12 = vadd.f32 %v2923_v8, %v910_v3  ;;  %v2130_v21 = vpop.eup %2129 }
 0x4fb   : > { %v903_v36 = vpop.permute.xlu0 %902  ;;  %v2132_v28 = vpop.eup %2131 }
 0x4fc   : > { %1007 = vst.msk [vmem:[#allocation4 + $0x28] sm:$0xff] %vm521_vm0, %v999_v12  ;;  %v912_v30 = vmul.f32 %v903_v36, %v864_v1  ;;  %1524 = vperm.xlu1 %2044, %v2128_v63   ;;  %v2134_v4 = vpop.eup %2133  ;;  %v1339_v24 = vpop.permute.xlu1 %1338 }
 0x4fd   : > { %1539 = vperm.xlu0 %2043, %v2130_v21   ;;  %v2136_v48 = vpop.eup %2135  ;;  %v1368_v29 = vmul.f32 %v1339_v24, %v1320_v10 }
 0x4fe   : > { %v1001_v52 = vadd.f32 %v2924_v9, %v912_v30  ;;  %v2138_v57 = vpop.eup %2137 }
 0x4ff   : > { %v2140_v55 = vpop.eup %2139  ;;  %v1334_v58 = vpop.permute.xlu0 %1333 }
 0x500   : > { %1009 = vst.msk [vmem:[#allocation4 + $0x38] sm:$0xff] %vm521_vm0, %v1001_v52  ;;  %1534 = vperm.xlu1 %2044, %v2132_v28   ;;  %v1349_v53 = vpop.permute.xlu1 %1348  ;;  %v1367_v61 = vmul.f32 %v1334_v58, %v1319_v15  ;;  %v1516_v15 = vld [vmem:[#allocation4 + $0x10] sm:$0xff] }
 0x501   : > { %1549 = vperm.xlu0 %2043, %v2134_v4   ;;  %v1370_v6 = vmul.f32 %v1349_v53, %v1322_v26 }
 0x503   : > { %v1344_v31 = vpop.permute.xlu0 %1343 }
 0x504   : > { %1544 = vperm.xlu1 %2044, %v2136_v48   ;;  %v1369_v17 = vmul.f32 %v1344_v31, %v1321_v27  ;;  %v1359_v35 = vpop.permute.xlu1 %1358 }
 0x505   : > { %1559 = vperm.xlu0 %2043, %v2138_v57   ;;  %v1372_v46 = vmul.f32 %v1359_v35, %v1324_v32  ;;  %v1515_v32 = vld [vmem:[#allocation4 + $0x8] sm:$0xff] }
 0x507   : > { %v1354_v38 = vpop.permute.xlu0 %1353 }
 0x508   : > { %1554 = vperm.xlu1 %2044, %v2140_v55   ;;  %v1371_v56 = vmul.f32 %v1354_v38, %v1323_v14 }
 0x50b   : > { %v1364_v47 = vpop.permute.xlu0 %1363 }
 0x50c   : > { %v1373_v25 = vmul.f32 %v1364_v47, %v1325_v41  ;;  %v1518_v47 = vld [vmem:[#allocation4 + $0x20] sm:$0xff] }
 0x513   : > { %v1984_v59 = vpop.f32.mrf.mxu0 }
 0x514   : > { %v1473_v7 = vadd.f32 %v1984_v59, %v1368_v29  ;;  %v1517_v29 = vld [vmem:[#allocation4 + $0x18] sm:$0xff] }
 0x515   : > { %v1440_v18 = vpop.f32.mrf.mxu0 }
 0x516   : > { %1481 = vst.msk [vmem:[#allocation4 + $0x50] sm:$0xff] %vm521_vm0, %v1473_v7  ;;  %v1471_v22 = vadd.f32 %v1440_v18, %v1366_v45 }
 0x517   : > { %v1985_v39 = vpop.f32.mrf.mxu0 }
 0x518   : > { %1479 = vst.msk [vmem:[#allocation4 + $0x40] sm:$0xff] %vm521_vm0, %v1471_v22  ;;  %v1474_v20 = vadd.f32 %v1985_v39, %v1369_v17  ;;  %v1514_v22 = vld [vmem:[#allocation4] sm:$0xff] }
 0x519   : > { %v1443_v40 = vpop.f32.mrf.mxu0 }
 0x51a   : > { %1482 = vst.msk [vmem:[#allocation4 + $0x58] sm:$0xff] %vm521_vm0, %v1474_v20  ;;  %v1472_v23 = vadd.f32 %v1443_v40, %v1367_v61 }
 0x51b   : > { %v1988_v51 = vpop.f32.mrf.mxu0 }
 0x51c   : > { %1480 = vst.msk [vmem:[#allocation4 + $0x48] sm:$0xff] %vm521_vm0, %v1472_v23  ;;  %v1477_v42 = vadd.f32 %v1988_v51, %v1372_v46  ;;  %v1519_v46 = vld [vmem:[#allocation4 + $0x28] sm:$0xff] }
 0x51d   : > { %v1456_v37 = vpop.f32.mrf.mxu0  ;;  %v1588_v11 = vld [vmem:[#allocation4 + $0x50] sm:$0xff] }
 0x51e   : > { %1485 = vst.msk [vmem:[#allocation4 + $0x70] sm:$0xff] %vm521_vm0, %v1477_v42  ;;  %v1475_v54 = vadd.f32 %v1456_v37, %v1370_v6  ;;  %v1521_v6 = vld [vmem:[#allocation4 + $0x38] sm:$0xff] }
 0x51f   : > { %v1989_v50 = vpop.f32.mrf.mxu0  ;;  %v1586_v43 = vld [vmem:[#allocation4 + $0x40] sm:$0xff] }
 0x520   : > { %1483 = vst.msk [vmem:[#allocation4 + $0x60] sm:$0xff] %vm521_vm0, %v1475_v54  ;;  %v1478_v13 = vadd.f32 %v1989_v50, %v1373_v25  ;;  %v1520_v50 = vld [vmem:[#allocation4 + $0x30] sm:$0xff] }
 0x521   : > { %v1459_v49 = vpop.f32.mrf.mxu0  ;;  %v1589_v2 = vld [vmem:[#allocation4 + $0x58] sm:$0xff] }
 0x522   : > { %1486 = vst.msk [vmem:[#allocation4 + $0x78] sm:$0xff] %vm521_vm0, %v1478_v13  ;;  %v1476_v44 = vadd.f32 %v1459_v49, %v1371_v56 }
 0x523   : > { %v1587_v60 = vld [vmem:[#allocation4 + $0x48] sm:$0xff] }
 0x524   : > { %1484 = vst.msk [vmem:[#allocation4 + $0x68] sm:$0xff] %vm521_vm0, %v1476_v44 }
 0x525   : > { %v1592_v48 = vld [vmem:[#allocation4 + $0x70] sm:$0xff] }
 0x527   : > { %v1590_v21 = vld [vmem:[#allocation4 + $0x60] sm:$0xff] }
 0x529   : > { %v1593_v9 = vld [vmem:[#allocation4 + $0x78] sm:$0xff] }
 0x52b   : > { %v1591_v12 = vld [vmem:[#allocation4 + $0x68] sm:$0xff] }
 0x55f   : > { %v1612_v19 = vpop.permute.xlu0 %1611 }
 0x560   : > { %v1637_v16 = vmul.f32 %v1612_v19, %v1589_v2 }
 0x562   : > { %1656 = vrot.lane.b32.xlu0 %v1637_v16, %s2184_s12 }
 0x563   : > { %v1607_v34 = vpop.permute.xlu1 %1606 }
 0x564   : > { %v1636_v33 = vmul.f32 %v1607_v34, %v1588_v11 }
 0x566   : > { %1654 = vrot.lane.b32.xlu1 %v1636_v33, %s2184_s12 }
 0x567   : > { %v1597_v62 = vpop.permute.xlu1 %1596 }
 0x568   : > { %v1602_v3 = vpop.permute.xlu0 %1601  ;;  %v1634_v1 = vmul.f32 %v1597_v62, %v1586_v43 }
 0x569   : > { %v1635_v8 = vmul.f32 %v1602_v3, %v1587_v60 }
 0x56a   : > { %1650 = vrot.lane.b32.xlu1 %v1634_v1, %s2184_s12 }
 0x56b   : > { %1652 = vrot.lane.b32.xlu0 %v1635_v8, %s2184_s12 }
 0x56c   : > { %v1622_v63 = vpop.permute.xlu0 %1621 }
 0x56d   : > { %v1639_v36 = vmul.f32 %v1622_v63, %v1591_v12 }
 0x56f   : > { %1660 = vrot.lane.b32.xlu0 %v1639_v36, %s2184_s12  ;;  %v1617_v30 = vpop.permute.xlu1 %1616 }
 0x570   : > { %v1632_v52 = vpop.permute.xlu0 %1631  ;;  %v1638_v28 = vmul.f32 %v1617_v30, %v1590_v21 }
 0x571   : > { %v1641_v4 = vmul.f32 %v1632_v52, %v1593_v9 }
 0x572   : > { %1658 = vrot.lane.b32.xlu1 %v1638_v28, %s2184_s12 }
 0x573   : > { %1664 = vrot.lane.b32.xlu0 %v1641_v4, %s2184_s12  ;;  %v1627_v57 = vpop.permute.xlu1 %1626 }
 0x574   : > { %v1640_v5 = vmul.f32 %v1627_v57, %v1592_v48  ;;  %v1530_v55 = vpop.permute.xlu0 %1529 }
 0x575   : > { %v1563_v39 = vmul.f32 %v1530_v55, %v1515_v32 }
 0x576   : > { %1662 = vrot.lane.b32.xlu1 %v1640_v5, %s2184_s12 }
 0x577   : > { %v1525_v58 = vpop.permute.xlu1 %1524 }
 0x578   : > { %v1540_v24 = vpop.permute.xlu0 %1539  ;;  %v1562_v35 = vmul.f32 %v1525_v58, %v1514_v22 }
 0x579   : > { %v1565_v27 = vmul.f32 %v1540_v24, %v1517_v29 }
 0x57b   : > { %v1535_v10 = vpop.permute.xlu1 %1534 }
 0x57c   : > { %v1550_v31 = vpop.permute.xlu0 %1549  ;;  %v1564_v38 = vmul.f32 %v1535_v10, %v1516_v15 }
 0x57d   : > { %v1567_v23 = vmul.f32 %v1550_v31, %v1519_v46 }
 0x57f   : > { %v1545_v0 = vpop.permute.xlu1 %1544 }
 0x580   : > { %v1560_v53 = vpop.permute.xlu0 %1559  ;;  %v1566_v42 = vmul.f32 %v1545_v0, %v1518_v47 }
 0x581   : > { %v1569_v14 = vmul.f32 %v1560_v53, %v1521_v6 }
 0x583   : > { %v1555_v59 = vpop.permute.xlu1 %1554 }
 0x584   : > { %v1568_v13 = vmul.f32 %v1555_v59, %v1520_v50 }
 0x5d4   : > { %v1657_v45 = vpop.permute.xlu0 %1656 }
 0x5d5   : > { %v1677_v7 = vsel %vm521_vm0, %v1565_v27, %v1657_v45 }
 0x5d6   : > { %1685 = vst [vmem:[%s2865_s4 + $0x18] sm:$0xff] %v1677_v7 }
 0x5d8   : > { %v1655_v18 = vpop.permute.xlu1 %1654 }
 0x5d9   : > { %v1676_v17 = vsel %vm521_vm0, %v1564_v38, %v1655_v18 }
 0x5da   : > { %1684 = vst [vmem:[%s2865_s4 + $0x10] sm:$0xff] %v1676_v17 }
 0x5dc   : > { %v1651_v61 = vpop.permute.xlu1 %1650 }
 0x5dd   : > { %v1653_v20 = vpop.permute.xlu0 %1652  ;;  %v1674_v26 = vsel %vm521_vm0, %v1562_v35, %v1651_v61 }
 0x5de   : > { %v1675_v40 = vsel %vm521_vm0, %v1563_v39, %v1653_v20  ;;  %1682 = vst [vmem:[%s2865_s4] sm:$0xff] %v1674_v26 }
 0x5df   : > { %1683 = vst [vmem:[%s2865_s4 + $0x8] sm:$0xff] %v1675_v40 }
 0x5e1   : > { %v1661_v41 = vpop.permute.xlu0 %1660 }
 0x5e2   : > { %v1679_v51 = vsel %vm521_vm0, %v1567_v23, %v1661_v41 }
 0x5e3   : > { %1687 = vst [vmem:[%s2865_s4 + $0x28] sm:$0xff] %v1679_v51 }
 0x5e4   : > { %v1659_v37 = vpop.permute.xlu1 %1658 }
 0x5e5   : > { %v1665_v25 = vpop.permute.xlu0 %1664  ;;  %v1678_v54 = vsel %vm521_vm0, %v1566_v42, %v1659_v37 }
 0x5e6   : > { %v1681_v56 = vsel %vm521_vm0, %v1569_v14, %v1665_v25  ;;  %1686 = vst [vmem:[%s2865_s4 + $0x20] sm:$0xff] %v1678_v54 }
 0x5e7   : > { %1689 = vst [vmem:[%s2865_s4 + $0x38] sm:$0xff] %v1681_v56 }
 0x5e8   : > { %v1663_v49 = vpop.permute.xlu1 %1662 }
 0x5e9   : > { %v1680_v44 = vsel %vm521_vm0, %v1568_v13, %v1663_v49 }
 0x5ea   : > { %1688 = vst [vmem:[%s2865_s4 + $0x30] sm:$0xff] %v1680_v44 }
 0x5eb PF: > { %s13_s16 = sadd.s32 1, %s2179_s16   ;;  %s2925_s12 = smov %s2167_s13 }
 0x5ec   : > { %p10_p10 = scmp.ge.s32.totalorder %s13_s16, 4   ;;  %s2926_s13 = smov %s2244_s21 }
 0x5ed   : > { %s2927_s14 = smov %s2175_s15  ;;  %s2928_s15 = smov %s2930_s17 }
 0x5ee   :  { %12 = sbr.rel (!%p10_p10) target bundleno = 3 (0x3), region = 208 }

</bundles_post_ra>
